<compile_context>
chip_gen: v6e
topology: v6e:2x2x1
jax: 0.10.0
libtpu: 0.0.40
codegen_flags: <defaults>
</compile_context>

<pallas_src>
import functools

import numpy as np
import jax
import jax.numpy as jnp
from jax.experimental import pallas as pl
from jax.experimental.pallas import tpu as pltpu

EPS = 1e-5
BN_SCALE = float(1.0 / np.sqrt(1.0 + EPS))   # eval BN with default running stats


def _round_up(x, m):
    return ((x + m - 1) // m) * m


def _vmem_caps():
    # v5e/v6e have 128 MiB VMEM -> raise the scoped limit / tile budget.
    # v7x has only 64 MiB -> stay conservative.
    try:
        cap = int(pltpu.get_tpu_info().vmem_capacity_bytes)
    except Exception:
        cap = 64 * 1024 * 1024
    if cap >= 100 * 1024 * 1024:
        return 64 * 1024 * 1024, 16 * 1024 * 1024
    return 32 * 1024 * 1024, 8 * 1024 * 1024


VMEM_LIMIT, _MAX_X_TILE_BYTES = _vmem_caps()
_ACC_BUDGET = 4 * 1024 * 1024      # f32 accumulator scratch budget per block
_BAND_BUDGET = 6 * 1024 * 1024     # bf16 input-band block budget


# --------------------------------------------------------------------------
# Pallas kernel 1: fused-tap convolution (stride 1), BN folded, bf16 MXU.
#   Input arrives as overlapping H-bands of the padded activation; the tap
#   loop + matmuls + residual/ReLU/cast epilogue all run in one kernel.
# --------------------------------------------------------------------------
def _fused_conv_kernel(*refs, kd, kh, kw, dil, Do, TH, Wo, C, relu, has_res):
    if has_res:
        xb_ref, w_ref, r_ref, o_ref, acc_ref = refs
    else:
        xb_ref, w_ref, o_ref, acc_ref = refs
    M = Do * TH * Wo
    tap = 0
    for a in range(kd):
        for i in range(kh):
            for j in range(kw):
                win = xb_ref[a * dil: a * dil + Do,
                             i * dil: i * dil + TH,
                             j * dil: j * dil + Wo, :]
                lhs = win.reshape(M, C)
                wk = w_ref[tap * C: (tap + 1) * C, :]
                p = jnp.dot(lhs, wk, preferred_element_type=jnp.float32)
                if tap == 0:
                    acc_ref[...] = p
                else:
                    acc_ref[...] += p
                tap += 1
    y = acc_ref[...]
    if has_res:
        y = y + r_ref[...].reshape(M, y.shape[1]).astype(jnp.float32)
    if relu:
        y = jnp.maximum(y, 0.0)
    o_ref[...] = y.reshape(o_ref.shape).astype(o_ref.dtype)


def _pick_th(Ho, Do, Wo, Dp, Wp, C, Cout, halo_h):
    cands = [c for c in (128, 64, 32, 16, 8, 4, 2, 1) if c <= Ho and Ho % c == 0]
    feas = []
    for c in cands:
        band = Dp * (c + halo_h) * Wp * C * 2
        acc = Do * c * Wo * Cout * 4
        if band <= _BAND_BUDGET and acc <= _ACC_BUDGET:
            feas.append(c)
    if not feas:
        return cands[-1]
    th = feas[0]
    if th == Ho and Ho >= 16 and len(feas) > 1:
        th = feas[1]                 # keep >= 2 H-bands (v7x has 2 TensorCores)
    return th


@functools.partial(jax.jit,
                   static_argnames=("kd", "kh", "kw", "dil", "pads", "relu",
                                    "out_dtype"))
def _fused_conv_nd(x, wmat, res, *, kd, kh, kw, dil, pads, relu,
                   out_dtype=jnp.bfloat16):
    """Stride-1 conv; x: (N,[D,]H,W,C); wmat: (kd*kh*kw*C, Cout) bf16 (BN folded)."""
    squeeze_d = (x.ndim == 4)
    if squeeze_d:
        x = x[:, None]
        if res is not None:
            res = res[:, None]
    x = x.astype(jnp.bfloat16)
    pd, ph, pw = pads
    if pd or ph or pw:
        x = jnp.pad(x, ((0, 0), (pd, pd), (ph, ph), (pw, pw), (0, 0)))
    N, Dp, Hp, Wp, C = x.shape
    Cout = wmat.shape[1]
    Do = Dp - dil * (kd - 1)
    Ho = Hp - dil * (kh - 1)
    Wo = Wp - dil * (kw - 1)
    halo_h = dil * (kh - 1)

    TH = _pick_th(Ho, Do, Wo, Dp, Wp, C, Cout, halo_h)
    nb = Ho // TH
    THb = TH + halo_h
    # Lightly-overlapping H-bands (~(TH+halo)/TH extra traffic, vs 9x/27x im2col).
    xb = jnp.stack([x[:, :, t * TH: t * TH + THb] for t in range(nb)], axis=1)

    kern = functools.partial(_fused_conv_kernel, kd=kd, kh=kh, kw=kw, dil=dil,
                             Do=Do, TH=TH, Wo=Wo, C=C, relu=relu,
                             has_res=res is not None)
    in_specs = [pl.BlockSpec((None, None, Dp, THb, Wp, C),
                             lambda n, t: (n, t, 0, 0, 0, 0)),
                pl.BlockSpec((kd * kh * kw * C, Cout), lambda n, t: (0, 0))]
    args = [xb, wmat]
    if res is not None:
        in_specs.append(pl.BlockSpec((None, Do, TH, Wo, Cout),
                                     lambda n, t: (n, 0, t, 0, 0)))
        args.append(res)

    out = pl.pallas_call(
        kern,
        out_shape=jax.ShapeDtypeStruct((N, Do, Ho, Wo, Cout), out_dtype),
        grid=(N, nb),
        in_specs=in_specs,
        out_specs=pl.BlockSpec((None, Do, TH, Wo, Cout),
                               lambda n, t: (n, 0, t, 0, 0)),
        scratch_shapes=[pltpu.VMEM((Do * TH * Wo, Cout), jnp.float32)],
        compiler_params=pltpu.CompilerParams(
            dimension_semantics=("parallel", "parallel"),
            vmem_limit_bytes=VMEM_LIMIT),
    )(*args)
    if squeeze_d:
        out = out[:, 0]
    return out


# --------------------------------------------------------------------------
# Pallas kernel 2: matmul with fused residual/ReLU epilogue (fallback path
# for stride-2 and 1x1 convolutions fed by materialized patches).
# --------------------------------------------------------------------------
def _mm_kernel(x_ref, w_ref, o_ref, *, relu):
    y = jnp.dot(x_ref[...], w_ref[...], preferred_element_type=jnp.float32)
    if relu:
        y = jnp.maximum(y, 0.0)
    o_ref[...] = y.astype(o_ref.dtype)


def _mm_res_kernel(x_ref, w_ref, r_ref, o_ref, *, relu):
    y = jnp.dot(x_ref[...], w_ref[...], preferred_element_type=jnp.float32)
    y = y + r_ref[...].astype(jnp.float32)
    if relu:
        y = jnp.maximum(y, 0.0)
    o_ref[...] = y.astype(o_ref.dtype)


def _pick_tm(M, K):
    cap = 2048
    while cap > 128 and cap * K * 2 > _MAX_X_TILE_BYTES:
        cap //= 2
    t = cap
    while t >= 16:
        if M >= t and M % t == 0:
            if M // t == 1 and t >= 512:
                t //= 2              # keep >= 2 grid steps for v7x's 2nd core
                continue
            return t
        t //= 2
    return min(_round_up(M, 16), cap)


def matmul_fused(x, w, relu=False, res=None, out_dtype=jnp.bfloat16):
    """maybe_relu(x @ w [+ res]); x:(M,K) bf16, w:(K,N) bf16."""
    M, K = x.shape
    N = w.shape[1]
    Np = N
    if N < 8:
        Np = 8
        w = jnp.pad(w, ((0, 0), (0, Np - N)))
        if res is not None:
            res = jnp.pad(res, ((0, 0), (0, Np - N)))
    tm = _pick_tm(M, K)
    Mp = _round_up(M, tm)
    if Mp != M:
        x = jnp.pad(x, ((0, Mp - M), (0, 0)))
        if res is not None:
            res = jnp.pad(res, ((0, Mp - M), (0, 0)))
    grid = (Mp // tm,)

    in_specs = [pl.BlockSpec((tm, K), lambda i: (i, 0)),
                pl.BlockSpec((K, Np), lambda i: (0, 0))]
    args = [x, w]
    if res is not None:
        in_specs.append(pl.BlockSpec((tm, Np), lambda i: (i, 0)))
        args.append(res)
        kern = functools.partial(_mm_res_kernel, relu=relu)
    else:
        kern = functools.partial(_mm_kernel, relu=relu)

    out = pl.pallas_call(
        kern,
        out_shape=jax.ShapeDtypeStruct((Mp, Np), out_dtype),
        grid=grid,
        in_specs=in_specs,
        out_specs=pl.BlockSpec((tm, Np), lambda i: (i, 0)),
        compiler_params=pltpu.CompilerParams(
            dimension_semantics=("parallel",),
            vmem_limit_bytes=VMEM_LIMIT),
    )(*args)
    if Mp != M or Np != N:
        out = out[:M, :N]
    return out


# --------------------------------------------------------------------------
# Pallas kernel 3: fused trilinear upsample + softmax + disparity regression.
# Reads only the coarse (N, D4, H4, W4) cost; interpolation matrices applied
# in-kernel; never materializes the (N, maxdisp, H, W) volume in HBM.
# --------------------------------------------------------------------------
def _head_kernel(c_ref, ah_ref, awt_ref, o_ref, t2_ref, *, D4, maxdisp, ad):
    ah = ah_ref[...]                         # (TH, H4)
    awt = awt_ref[...]                       # (W4, Wout)
    for d in range(D4):
        t1 = jnp.dot(ah, c_ref[d], preferred_element_type=jnp.float32)
        t2_ref[d] = jnp.dot(t1, awt, preferred_element_type=jnp.float32)

    def cost_at(do):                         # <=2 nonzero static interp weights
        row = ad[do]
        nz = np.nonzero(row)[0]
        v = t2_ref[int(nz[0])] * float(row[nz[0]])
        for idx in nz[1:]:
            v = v + t2_ref[int(idx)] * float(row[idx])
        return v

    m = cost_at(0)
    for do in range(1, maxdisp):
        m = jnp.maximum(m, cost_at(do))
    den = jnp.zeros_like(m)
    num = jnp.zeros_like(m)
    for do in range(maxdisp):
        e = jnp.exp(cost_at(do) - m)
        den = den + e
        num = num + e * float(do)
    o_ref[...] = num * pl.reciprocal(den, approx=True)


def _interp_matrix_np(out_size, in_size, align_corners):
    A = np.zeros((out_size, in_size), dtype=np.float32)
    for o in range(out_size):
        if align_corners:
            src = 0.0 if out_size == 1 else o * (in_size - 1) / (out_size - 1)
        else:
            src = max((o + 0.5) * in_size / out_size - 0.5, 0.0)
        i0 = min(int(np.floor(src)), in_size - 1)
        i1 = min(i0 + 1, in_size - 1)
        w1 = src - i0
        A[o, i0] += 1.0 - w1
        A[o, i1] += w1
    return A


def disparity_head(cost, maxdisp, Hout, Wout):
    """cost: (N, D4, H4, W4) f32 -> (N, Hout, Wout) expected disparity."""
    N, D4, H4, W4 = cost.shape
    ad = _interp_matrix_np(maxdisp, D4, False)              # static, baked in
    ah = jnp.asarray(_interp_matrix_np(Hout, H4, False))    # (Hout, H4)
    awt = jnp.asarray(_interp_matrix_np(Wout, W4, False).T)  # (W4, Wout)
    TH = Hout
    for c in (32, 16, 8):
        if Hout % c == 0:
            TH = c
            break
    grid = (N, Hout // TH)
    kern = functools.partial(_head_kernel, D4=D4, maxdisp=maxdisp, ad=ad)
    return pl.pallas_call(
        kern,
        out_shape=jax.ShapeDtypeStruct((N, Hout, Wout), jnp.float32),
        grid=grid,
        in_specs=[pl.BlockSpec((None, D4, H4, W4), lambda n, t: (n, 0, 0, 0)),
                  pl.BlockSpec((TH, H4), lambda n, t: (t, 0)),
                  pl.BlockSpec((W4, Wout), lambda n, t: (0, 0))],
        out_specs=pl.BlockSpec((None, TH, Wout), lambda n, t: (n, t, 0)),
        scratch_shapes=[pltpu.VMEM((D4, TH, Wout), jnp.float32)],
        compiler_params=pltpu.CompilerParams(
            dimension_semantics=("parallel", "arbitrary"),
            vmem_limit_bytes=VMEM_LIMIT),
    )(cost, ah, awt)


# --------------------------------------------------------------------------
# Fallback im2col conv wrappers (stride-2 / 1x1 convs only)
# --------------------------------------------------------------------------
@functools.partial(jax.jit,
                   static_argnames=("kh", "kw", "stride", "padding", "dilation",
                                    "relu", "out_dtype"))
def conv2d_im2col(x, wmat, res=None, *, kh, kw, stride, padding, dilation, relu,
                  out_dtype=jnp.bfloat16):
    N, H, W, C = x.shape
    Cout = wmat.shape[1]
    x = x.astype(jnp.bfloat16)
    if padding:
        x = jnp.pad(x, ((0, 0), (padding, padding), (padding, padding), (0, 0)))
    Ho = (H + 2 * padding - dilation * (kh - 1) - 1) // stride + 1
    Wo = (W + 2 * padding - dilation * (kw - 1) - 1) // stride + 1
    cols = []
    for i in range(kh):
        for j in range(kw):
            cols.append(x[:, i * dilation: i * dilation + (Ho - 1) * stride + 1: stride,
                             j * dilation: j * dilation + (Wo - 1) * stride + 1: stride, :])
    patches = jnp.stack(cols, axis=3).reshape(N * Ho * Wo, kh * kw * C)
    r = None if res is None else res.reshape(N * Ho * Wo, Cout)
    out = matmul_fused(patches, wmat, relu=relu, res=r, out_dtype=out_dtype)
    return out.reshape(N, Ho, Wo, Cout)


@functools.partial(jax.jit,
                   static_argnames=("kd", "kh", "kw", "stride", "padding", "relu",
                                    "out_dtype"))
def conv3d_im2col(x, wmat, res=None, *, kd, kh, kw, stride, padding, relu,
                  out_dtype=jnp.bfloat16):
    N, D, H, W, C = x.shape
    Cout = wmat.shape[1]
    x = x.astype(jnp.bfloat16)
    p = padding
    if p:
        x = jnp.pad(x, ((0, 0), (p, p), (p, p), (p, p), (0, 0)))
    Do = (D + 2 * p - kd) // stride + 1
    Ho = (H + 2 * p - kh) // stride + 1
    Wo = (W + 2 * p - kw) // stride + 1
    cols = []
    for a in range(kd):
        for i in range(kh):
            for j in range(kw):
                cols.append(x[:, a: a + (Do - 1) * stride + 1: stride,
                                 i: i + (Ho - 1) * stride + 1: stride,
                                 j: j + (Wo - 1) * stride + 1: stride, :])
    patches = jnp.stack(cols, axis=4).reshape(N * Do * Ho * Wo, kd * kh * kw * C)
    r = None if res is None else res.reshape(N * Do * Ho * Wo, Cout)
    out = matmul_fused(patches, wmat, relu=relu, res=r, out_dtype=out_dtype)
    return out.reshape(N, Do, Ho, Wo, Cout)


# --------------------------------------------------------------------------
# Conv routing (fused kernel for stride-1, fallback otherwise)
# --------------------------------------------------------------------------
def conv2d(x, layer, stride=1, padding=0, dilation=1, relu=False, res=None,
           out_dtype=jnp.bfloat16):
    k = layer['k']
    W = x.shape[2]
    Wo = W + 2 * padding - dilation * (k - 1)
    if k > 1 and stride == 1 and Wo % 8 == 0:
        return _fused_conv_nd(x, layer['w'], res, kd=1, kh=k, kw=k, dil=dilation,
                              pads=(0, padding, padding), relu=relu,
                              out_dtype=out_dtype)
    return conv2d_im2col(x, layer['w'], res, kh=k, kw=k, stride=stride,
                         padding=padding, dilation=dilation, relu=relu,
                         out_dtype=out_dtype)


def conv3d(x, layer, stride=1, padding=0, relu=False, res=None,
           out_dtype=jnp.bfloat16):
    k = layer['k']
    W = x.shape[3]
    Wo = W + 2 * padding - (k - 1)
    if k > 1 and stride == 1 and Wo % 8 == 0:
        return _fused_conv_nd(x, layer['w'], res, kd=k, kh=k, kw=k, dil=1,
                              pads=(padding, padding, padding), relu=relu,
                              out_dtype=out_dtype)
    return conv3d_im2col(x, layer['w'], res, kd=k, kh=k, kw=k, stride=stride,
                         padding=padding, relu=relu, out_dtype=out_dtype)


def conv_transpose3d(x, layer):
    # ConvTranspose3d(k=3, stride=2, pad=1, output_pad=1) + folded BN via
    # sub-pixel phase decomposition merged into one fused k=2 stride-1 conv.
    N, D, H, W, C = x.shape
    xp = jnp.pad(x.astype(jnp.bfloat16), ((0, 0), (0, 1), (0, 1), (0, 1), (0, 0)))
    y = _fused_conv_nd(xp, layer['w'], None, kd=2, kh=2, kw=2, dil=1,
                       pads=(0, 0, 0), relu=False, out_dtype=jnp.bfloat16)
    cout = y.shape[-1] // 8
    y = y.reshape(N, D, H, W, 2, 2, 2, cout)
    y = jnp.transpose(y, (0, 1, 4, 2, 5, 3, 6, 7)).reshape(N, 2 * D, 2 * H, 2 * W, cout)
    return y


# --------------------------------------------------------------------------
# Small JAX glue: avg-pool, bilinear interpolation, cost volume
# --------------------------------------------------------------------------
def avg_pool2d(x, k):
    N, H, W, C = x.shape
    return x.astype(jnp.float32).reshape(N, H // k, k, W // k, k, C).mean(axis=(2, 4))


def upsample_bilinear_align(x, out_h, out_w):
    # NHWC, align_corners=True (matches F.upsample(..., align_corners=True))
    N, H, W, C = x.shape
    Ah = jnp.asarray(_interp_matrix_np(out_h, H, True))
    Aw = jnp.asarray(_interp_matrix_np(out_w, W, True))
    y = jnp.einsum('ah,nhwc->nawc', Ah, x.astype(jnp.float32))
    y = jnp.einsum('bw,nawc->nabc', Aw, y)
    return y.astype(jnp.bfloat16)


def build_cost_volume(ref, tgt, D):
    # ref, tgt: (N, H, W, C) bf16 -> (N, D, H, W, 2C) bf16; zeros past the shift.
    slices = []
    for i in range(D):
        if i > 0:
            r = jnp.pad(ref[:, :, i:, :], ((0, 0), (0, 0), (i, 0), (0, 0)))
            t = jnp.pad(tgt[:, :, :-i, :], ((0, 0), (0, 0), (i, 0), (0, 0)))
        else:
            r, t = ref, tgt
        slices.append(jnp.concatenate([r, t], axis=-1))
    return jnp.stack(slices, axis=1)


# --------------------------------------------------------------------------
# Parameters: deterministic synthetic init, BN folded, bf16 matmul-ready mats
# --------------------------------------------------------------------------
class ParamGen:
    def __init__(self, seed):
        self._key = jax.random.PRNGKey(seed)
        self._n = 0

    def normal(self, shape, std):
        self._n += 1
        k = jax.random.fold_in(self._key, self._n)
        return std * jax.random.normal(k, shape, dtype=jnp.float32)


def build_params(seed=42):
    pg = ParamGen(seed)

    def conv2d_layer(cout, cin, k, bn=True):
        w = pg.normal((cout, cin, k, k), float(np.sqrt(2.0 / (k * k * cout))))
        wm = jnp.transpose(w, (2, 3, 1, 0)).reshape(k * k * cin, cout)
        if bn:
            wm = wm * BN_SCALE
        return {'w': wm.astype(jnp.bfloat16), 'k': k}

    def conv3d_layer(cout, cin, k, bn=True, cout_pad=None):
        w = pg.normal((cout, cin, k, k, k), float(np.sqrt(2.0 / (k ** 3 * cout))))
        wm = jnp.transpose(w, (2, 3, 4, 1, 0)).reshape(k ** 3 * cin, cout)
        if bn:
            wm = wm * BN_SCALE
        if cout_pad is not None and cout_pad > cout:
            wm = jnp.pad(wm, ((0, 0), (0, cout_pad - cout)))
        return {'w': wm.astype(jnp.bfloat16), 'k': k}

    def convT3d_layer(cin, cout, k=3):
        # torch ConvTranspose3d layout (Cin, Cout, kd, kh, kw) -> merged
        # phase-decomposition matrix of shape (8*Cin, 8*Cout), BN folded.
        wT = pg.normal((cin, cout, k, k, k), float(np.sqrt(2.0 / (k ** 3 * cout))))
        wf = np.asarray(jnp.transpose(wT[:, :, ::-1, ::-1, ::-1], (1, 0, 2, 3, 4)))
        wf = wf * BN_SCALE                               # (cout, cin, 3, 3, 3)
        IDX = {(0, 0): 1, (0, 1): -1, (1, 0): 0, (1, 1): 2}
        cols = []
        for qd in (0, 1):
            for qh in (0, 1):
                for qw in (0, 1):
                    sub = np.zeros((cout, cin, 2, 2, 2), np.float32)
                    for od in (0, 1):
                        for oh in (0, 1):
                            for ow in (0, 1):
                                a = IDX[(qd, od)]
                                b = IDX[(qh, oh)]
                                c = IDX[(qw, ow)]
                                if a < 0 or b < 0 or c < 0:
                                    continue
                                sub[:, :, od, oh, ow] = wf[:, :, a, b, c]
                    cols.append(sub.transpose(2, 3, 4, 1, 0).reshape(8 * cin, cout))
        wall = np.concatenate(cols, axis=1)              # (8*cin, 8*cout)
        return {'w': jnp.asarray(wall, jnp.bfloat16), 'k': k}

    fe = {}
    fe['fc'] = [conv2d_layer(32, 3, 3), conv2d_layer(32, 32, 3), conv2d_layer(32, 32, 3)]

    def make_layer(inplanes, planes, blocks, stride):
        layers = []
        for b in range(blocks):
            inp = inplanes if b == 0 else planes
            blk = {'w1': conv2d_layer(planes, inp, 3), 'w2': conv2d_layer(planes, planes, 3)}
            if b == 0 and (stride != 1 or inplanes != planes):
                blk['wd'] = conv2d_layer(planes, inp, 1)
            layers.append(blk)
        return layers

    fe['layer1'] = make_layer(32, 32, 3, 1)
    fe['layer2'] = make_layer(32, 64, 16, 2)
    fe['layer3'] = make_layer(64, 128, 3, 1)
    fe['layer4'] = make_layer(128, 128, 3, 1)
    fe['branch'] = [conv2d_layer(32, 128, 1) for _ in range(4)]
    fe['last1'] = conv2d_layer(128, 320, 3)
    fe['last2'] = conv2d_layer(32, 128, 1, bn=False)

    P = {'fe': fe}
    P['dres0'] = [conv3d_layer(32, 64, 3), conv3d_layer(32, 32, 3)]
    P['dres1'] = [conv3d_layer(32, 32, 3), conv3d_layer(32, 32, 3)]

    def hg():
        return {'c1': conv3d_layer(64, 32, 3), 'c2': conv3d_layer(64, 64, 3),
                'c3': conv3d_layer(64, 64, 3), 'c4': conv3d_layer(64, 64, 3),
                'c5': convT3d_layer(64, 64, 3), 'c6': convT3d_layer(64, 32, 3)}

    P['hg'] = [hg(), hg(), hg()]
    # classif final conv: Cout=1 padded to 8 lanes (zeros), no BN.
    P['classif'] = [[conv3d_layer(32, 32, 3),
                     conv3d_layer(1, 32, 3, bn=False, cout_pad=8)]
                    for _ in range(3)]
    return P


# --------------------------------------------------------------------------
# Model forward (PSMNet, eval mode)
# --------------------------------------------------------------------------
def basic_block_fwd(p, x, stride, dilation):
    pad = dilation if dilation > 1 else 1
    out = conv2d(x, p['w1'], stride=stride, padding=pad, dilation=dilation, relu=True)
    if 'wd' in p:
        sc = conv2d(x, p['wd'], stride=stride, padding=0, dilation=1, relu=False)
    else:
        sc = x
    # residual add fused into the second conv's epilogue (no final ReLU)
    return conv2d(out, p['w2'], stride=1, padding=pad, dilation=dilation,
                  relu=False, res=sc)


def feature_extraction_fwd(P, x):
    y = conv2d(x, P['fc'][0], stride=2, padding=1, relu=True)
    y = conv2d(y, P['fc'][1], stride=1, padding=1, relu=True)
    y = conv2d(y, P['fc'][2], stride=1, padding=1, relu=True)

    for blk in P['layer1']:
        y = basic_block_fwd(blk, y, 1, 1)
    for bi, blk in enumerate(P['layer2']):
        y = basic_block_fwd(blk, y, 2 if bi == 0 else 1, 1)
    output_raw = y
    for blk in P['layer3']:
        y = basic_block_fwd(blk, y, 1, 1)
    for blk in P['layer4']:
        y = basic_block_fwd(blk, y, 1, 2)
    output_skip = y

    Hs, Ws = output_skip.shape[1], output_skip.shape[2]
    branches = []
    for layer, pk in zip(P['branch'], (64, 32, 16, 8)):
        p_ = avg_pool2d(output_skip, pk)
        p_ = conv2d(p_, layer, stride=1, padding=0, relu=True)
        branches.append(upsample_bilinear_align(p_, Hs, Ws))
    b1, b2, b3, b4 = branches

    feat = jnp.concatenate([output_raw, output_skip, b4, b3, b2, b1], axis=-1)
    feat = conv2d(feat, P['last1'], stride=1, padding=1, relu=True)
    feat = conv2d(feat, P['last2'], stride=1, padding=0, relu=False)
    return feat


def hourglass_fwd(p, x, presqu, postsqu):
    out = conv3d(x, p['c1'], stride=2, padding=1, relu=True)
    # pre = relu(conv2(out) [+ postsqu])  -- residual + ReLU fused into epilogue
    pre = conv3d(out, p['c2'], stride=1, padding=1, relu=True, res=postsqu)
    out = conv3d(pre, p['c3'], stride=2, padding=1, relu=True)
    out = conv3d(out, p['c4'], stride=1, padding=1, relu=True)
    c5 = conv_transpose3d(out, p['c5'])
    if presqu is not None:
        post = jnp.maximum(c5 + presqu, 0.0)
    else:
        post = jnp.maximum(c5 + pre, 0.0)
    out = conv_transpose3d(post, p['c6'])
    return out, pre, post


def classif_fwd(p, x, prev):
    y = conv3d(x, p[0], stride=1, padding=1, relu=True)
    # final conv: no BN, no ReLU; "+ previous cost" fused via res; f32 output
    return conv3d(y, p[1], stride=1, padding=1, relu=False, res=prev,
                  out_dtype=jnp.float32)


def psmnet_forward(P, left, right, maxdisp):
    # left/right: NCHW (PyTorch) -> NHWC internally; batch both towers together.
    Hin, Win = left.shape[2], left.shape[3]
    n = left.shape[0]
    imgs = jnp.transpose(jnp.concatenate([left, right], axis=0), (0, 2, 3, 1))

    feats = feature_extraction_fwd(P['fe'], imgs)      # (2N, H/4, W/4, 32) bf16
    ref, tgt = feats[:n], feats[n:]

    D4 = maxdisp // 4
    cost = build_cost_volume(ref, tgt, D4)             # (N, D4, H/4, W/4, 64) bf16

    c = conv3d(cost, P['dres0'][0], stride=1, padding=1, relu=True)
    cost0 = conv3d(c, P['dres0'][1], stride=1, padding=1, relu=True)
    c = conv3d(cost0, P['dres1'][0], stride=1, padding=1, relu=True)
    cost0 = conv3d(c, P['dres1'][1], stride=1, padding=1, relu=False, res=cost0)

    out1, pre1, post1 = hourglass_fwd(P['hg'][0], cost0, None, None)
    out1 = out1 + cost0
    out2, pre2, post2 = hourglass_fwd(P['hg'][1], out1, pre1, post1)
    out2 = out2 + cost0
    out3, pre3, post3 = hourglass_fwd(P['hg'][2], out2, pre1, post2)
    out3 = out3 + cost0

    cost1 = classif_fwd(P['classif'][0], out1, None)        # f32, 8-ch padded
    cost2 = classif_fwd(P['classif'][1], out2, cost1)       # "+cost1" fused
    cost3 = classif_fwd(P['classif'][2], out3, cost2)       # "+cost2" fused

    # eval path: fused trilinear upsample + softmax + disparity regression
    pred3 = disparity_head(cost3[..., 0], maxdisp, Hin, Win)  # (N, H, W)
    return pred3


# --------------------------------------------------------------------------
if __name__ == "__main__":
    maxdisp = 16             # smallest maxdisp whose D/4 survives the hourglass
    N, Hin, Win = 1, 256, 256    # smallest spatial size valid for AvgPool2d((64,64))

    key = jax.random.PRNGKey(0)
    kl, kr = jax.random.split(key)
    left = jax.random.normal(kl, (N, 3, Hin, Win), dtype=jnp.float32)    # NCHW
    right = jax.random.normal(kr, (N, 3, Hin, Win), dtype=jnp.float32)   # NCHW

    params = build_params(seed=42)

    pred3 = psmnet_forward(params, left, right, maxdisp)
    pred3 = jax.block_until_ready(pred3)

    assert pred3.shape == (N, Hin, Win), pred3.shape
    assert bool(jnp.all(jnp.isfinite(pred3)))
    assert bool(jnp.all(pred3 >= -1e-2)) and bool(jnp.all(pred3 <= maxdisp + 1e-2))
    print("KERNEL_OK")
</pallas_src>

<mosaic_0001>
module attributes {stable_mosaic.version = 11 : i64} {
  func.func @_mm_kernel(%arg0: i32, %arg1: memref<2048x27xbf16, #tpu.memory_space<vmem>>, %arg2: memref<27x32xbf16, #tpu.memory_space<vmem>>, %arg3: memref<2048x32xbf16, #tpu.memory_space<vmem>>) attributes {dimension_semantics = [#tpu.dimension_semantics<parallel>], iteration_bounds = array<i64: 16>, scalar_prefetch = 0 : i64, scratch_operands = 0 : i64, tpu.core_type = #tpu.core_type<tc>, window_params = [{transform_indices = @transform_0, window_bounds = array<i64: 2048, 27>}, {pipeline_mode = #tpu.pipeline_mode<synchronous>, transform_indices = @transform_1, window_bounds = array<i64: 27, 32>}, {transform_indices = @transform_2, window_bounds = array<i64: 2048, 32>}]} {
    %c0 = arith.constant 0 : index
    %c0_0 = arith.constant 0 : index
    %0 = vector.load %arg1[%c0, %c0_0] : memref<2048x27xbf16, #tpu.memory_space<vmem>>, vector<2048x27xbf16>
    %c0_1 = arith.constant 0 : index
    %c0_2 = arith.constant 0 : index
    %1 = vector.load %arg2[%c0_1, %c0_2] : memref<27x32xbf16, #tpu.memory_space<vmem>>, vector<27x32xbf16>
    %cst = arith.constant dense<0.000000e+00> : vector<2048x32xf32>
    %2 = tpu.matmul %0, %1, %cst {dimension_numbers = #tpu.dot_dimension_numbers<[1], [0], [0], [1], [0, 0, 1, 1], [], []>} : vector<2048x27xbf16>, vector<27x32xbf16>, vector<2048x32xf32> -> vector<2048x32xf32>
    %cst_3 = arith.constant 0.000000e+00 : f32
    %3 = vector.broadcast %cst_3 : f32 to vector<2048x32xf32>
    %4 = arith.maximumf %2, %3 : vector<2048x32xf32>
    %5 = arith.truncf %4 : vector<2048x32xf32> to vector<2048x32xbf16>
    %c0_4 = arith.constant 0 : index
    %c0_5 = arith.constant 0 : index
    %6 = vector.load %arg3[%c0_4, %c0_5] : memref<2048x32xbf16, #tpu.memory_space<vmem>>, vector<2048x32xbf16>
    tpu.vector_store %arg3[%c0_4, %c0_5], %5 {strides = array<i32>} : memref<2048x32xbf16, #tpu.memory_space<vmem>>, vector<2048x32xbf16>,
    return
  }
  func.func @transform_0(%arg0: i32) -> (i32, i32) {
    %c0_i32 = arith.constant 0 : i32
    %c0_i32_0 = arith.constant 0 : i32
    return %arg0, %c0_i32 : i32, i32
  }
  func.func @transform_1(%arg0: i32) -> (i32, i32) {
    %c0_i32 = arith.constant 0 : i32
    %c0_i32_0 = arith.constant 0 : i32
    %c0_i32_1 = arith.constant 0 : i32
    return %c0_i32, %c0_i32_0 : i32, i32
  }
  func.func @transform_2(%arg0: i32) -> (i32, i32) {
    %c0_i32 = arith.constant 0 : i32
    %c0_i32_0 = arith.constant 0 : i32
    return %arg0, %c0_i32 : i32, i32
  }
}

</mosaic_0001>

<bundles_post_ra>
// kernel: conv2d_im2col.1
= control target key start
LH: loop header
LB: loop body
LE: loop exit
PB: predicated region body
PF: predicated region fallthrough
CT: control target
= control target key end

     0   :  { %s5439_s9 = smov 0   ;;  %s6241_s0 = inlined_call_operand.vmem [shape: bf16[32768,27], index: 0, kind: input, shape index: {}]   ;;  %s6242_s1 = inlined_call_operand.vmem [shape: bf16[27,32], index: 1, kind: input, shape index: {}]   ;;  %s6243_s2 = inlined_call_operand.vmem [shape: bf16[32768,32], index: 2, kind: output, shape index: {}]  }
   0x1 LB: > { %s4101_s10 = sadd.s32 4294967295, %s5421_s9   ;;  %p4105_p0 = scmp.ge.s32.totalorder %s5421_s9, 1  ;;  %s5421_s9 = sphi %s5439_s9, %s12_s9  }
   0x2   : > { %p113_p1 = scmp.lt.s32.totalorder %s5421_s9, 17 }
   0x4   : > { %p114_p2 = pnand %p4105_p0, %p113_p1 }
   0x5   : > { %s4106_s13 = sshll.u32 (!%p114_p2), %s4101_s10, 8 }
   0x6   : > { %117 = sbr.rel (%p114_p2) target bundleno = 476 (0x1dc), region = 28  ;;  %p136_p3 = scmp.lt.s32.totalorder (!%p114_p2), %s4106_s13, 4095 }
   0xb   : > { %v5285_v0 = vld [vmem:[%s6242_s1 + $0x8] sm:$0x3f]   ;;  %vm1444_vm0 = vcmask 1044480   ;;  %vm1445_vm1 = vcmask 1045504   ;;  %v5423_v1 = vmov 65535   ;;  %v5286_v5 = vld [vmem:[%s6242_s1] sm:$0xff]  }
   0xc   : > { %v1446_v2 = vsel %vm1444_vm0, 4294967295, %v5423_v1  ;;  %s6245_s13 = smov (!%p136_p3, %s4106_s13), 4095  ;;  %vm1059_vm2 = vcmask 220160   ;;  %vm3788_vm3 = vcmask 257024  }
   0xd   : > { %v1447_v3 = vsel %vm1445_vm1, %v1446_v2, 0  ;;  %s4107_s16 = sshll.u32 %s6245_s13, 2 }
   0xe   : > { %v1449_v4 = vand.u32 %v5285_v0, %v1447_v3  ;;  %s5461_s19 = scalar_lea.vmem %s6241_s0, %s4107_s16  ;;  %s5672_s22 = scalar_lea.vmem %s6243_s2, %s4107_s16 }
   0xf   : > { %v5287_v6 = vld [vmem:[%s5461_s19] sm:$0xff]   ;;  %v5289_v8 = vld [vmem:[%s5461_s19 + $0x8] sm:$0xff]   ;;  %v5291_v10 = vld [vmem:[%s5461_s19 + $0x10] sm:$0xff]  }
  0x10   : > { %5012 = vmatprep.subr.bf16.mxu0 %v1449_v4  ;;  %5272 = vmatprep.subr.bf16.mxu1 %v1449_v4  ;;  %v5288_v7 = vld [vmem:[%s5461_s19 + $0x200] sm:$0xff]   ;;  %v5290_v9 = vld [vmem:[%s5461_s19 + $0x208] sm:$0xff]   ;;  %v5292_v11 = vld [vmem:[%s5461_s19 + $0x210] sm:$0xff]  }
  0x11   : > { %5013 = vmatpush3.bf16.msra.mxu0 %v1449_v4  ;;  %5274 = vmatpush3.bf16.msra.mxu1 %v1449_v4  ;;  %v5293_v12 = vld [vmem:[%s5461_s19 + $0x18] sm:$0xff]   ;;  %v5295_v14 = vld [vmem:[%s5461_s19 + $0x20] sm:$0xff]   ;;  %v5297_v16 = vld [vmem:[%s5461_s19 + $0x28] sm:$0xff]  }
  0x12   : > { %5014 = vmatprep.subr.bf16.mxu0 %v5286_v5  ;;  %5273 = vmatprep.subr.bf16.mxu1 %v5286_v5  ;;  %v5294_v13 = vld [vmem:[%s5461_s19 + $0x218] sm:$0xff]   ;;  %v5296_v15 = vld [vmem:[%s5461_s19 + $0x220] sm:$0xff]   ;;  %v5298_v17 = vld [vmem:[%s5461_s19 + $0x228] sm:$0xff]  }
  0x13   : > { %5016 = vmatprep.mubr.msk.bf16.mxu0 %vm1059_vm2, %v5287_v6  ;;  %5144 = vmatprep.mubr.msk.bf16.mxu1 %vm1059_vm2, %v5288_v7  ;;  %v5299_v18 = vld [vmem:[%s5461_s19 + $0x30] sm:$0xff]   ;;  %v5301_v20 = vld [vmem:[%s5461_s19 + $0x38] sm:$0xff]   ;;  %v5303_v22 = vld [vmem:[%s5461_s19 + $0x40] sm:$0xff]  }
  0x14   : > { %v5300_v19 = vld [vmem:[%s5461_s19 + $0x230] sm:$0xff]   ;;  %v5302_v21 = vld [vmem:[%s5461_s19 + $0x238] sm:$0xff]   ;;  %v5304_v23 = vld [vmem:[%s5461_s19 + $0x240] sm:$0xff]  }
  0x15   : > { %5015 = vmatpush3.bf16.msra.mxu0 %v5286_v5  ;;  %5275 = vmatpush3.bf16.msra.mxu1 %v5286_v5  ;;  %v5305_v24 = vld [vmem:[%s5461_s19 + $0x48] sm:$0xff]   ;;  %v5307_v26 = vld [vmem:[%s5461_s19 + $0x50] sm:$0xff]   ;;  %v5309_v28 = vld [vmem:[%s5461_s19 + $0x58] sm:$0xff]  }
  0x16   : > { %v5306_v25 = vld [vmem:[%s5461_s19 + $0x248] sm:$0xff]   ;;  %v5308_v27 = vld [vmem:[%s5461_s19 + $0x250] sm:$0xff]   ;;  %v5310_v29 = vld [vmem:[%s5461_s19 + $0x258] sm:$0xff]  }
  0x17   : > { %v5311_v30 = vld [vmem:[%s5461_s19 + $0x60] sm:$0xff]   ;;  %v5313_v32 = vld [vmem:[%s5461_s19 + $0x68] sm:$0xff]   ;;  %v5315_v34 = vld [vmem:[%s5461_s19 + $0x70] sm:$0xff]  }
  0x18   : > { %5017 = vmatmul.mubr.msk.bf16.vlgmr.msra.gmra.mxu0 %vm1059_vm2, %v5289_v8  ;;  %5145 = vmatmul.mubr.msk.bf16.vlgmr.msra.gmra.mxu1 %vm1059_vm2, %v5290_v9  ;;  %v5312_v31 = vld [vmem:[%s5461_s19 + $0x260] sm:$0xff]   ;;  %v5314_v33 = vld [vmem:[%s5461_s19 + $0x268] sm:$0xff]   ;;  %v5316_v35 = vld [vmem:[%s5461_s19 + $0x270] sm:$0xff]  }
  0x19   : > { %5020 = vmatprep.mubr.msk.bf16.mxu0 %vm1059_vm2, %v5291_v10  ;;  %5148 = vmatprep.mubr.msk.bf16.mxu1 %vm1059_vm2, %v5292_v11  ;;  %v5317_v36 = vld [vmem:[%s5461_s19 + $0x78] sm:$0xff]   ;;  %v5319_v38 = vld [vmem:[%s5461_s19 + $0x80] sm:$0xff]   ;;  %v5321_v40 = vld [vmem:[%s5461_s19 + $0x88] sm:$0xff]  }
  0x1a   : > { %v5318_v37 = vld [vmem:[%s5461_s19 + $0x278] sm:$0xff]   ;;  %v5320_v39 = vld [vmem:[%s5461_s19 + $0x280] sm:$0xff]   ;;  %v5322_v41 = vld [vmem:[%s5461_s19 + $0x288] sm:$0xff]  }
  0x1b   : > { %v5323_v42 = vld [vmem:[%s5461_s19 + $0x90] sm:$0xff]   ;;  %v5325_v44 = vld [vmem:[%s5461_s19 + $0x98] sm:$0xff]   ;;  %v5327_v46 = vld [vmem:[%s5461_s19 + $0xa0] sm:$0xff]  }
  0x1c   : > { %v5324_v43 = vld [vmem:[%s5461_s19 + $0x290] sm:$0xff]   ;;  %v5326_v45 = vld [vmem:[%s5461_s19 + $0x298] sm:$0xff]   ;;  %v5328_v47 = vld [vmem:[%s5461_s19 + $0x2a0] sm:$0xff]  }
  0x1d   : > { %v5329_v48 = vld [vmem:[%s5461_s19 + $0xa8] sm:$0xff]   ;;  %v5331_v50 = vld [vmem:[%s5461_s19 + $0xb0] sm:$0xff]   ;;  %v5333_v52 = vld [vmem:[%s5461_s19 + $0xb8] sm:$0xff]  }
  0x1e   : > { %v5330_v49 = vld [vmem:[%s5461_s19 + $0x2a8] sm:$0xff]   ;;  %v5332_v51 = vld [vmem:[%s5461_s19 + $0x2b0] sm:$0xff]   ;;  %v5334_v53 = vld [vmem:[%s5461_s19 + $0x2b8] sm:$0xff]  }
  0x1f   : > { %v5335_v54 = vld [vmem:[%s5461_s19 + $0xc0] sm:$0xff]   ;;  %v5337_v56 = vld [vmem:[%s5461_s19 + $0xc8] sm:$0xff]   ;;  %v5339_v58 = vld [vmem:[%s5461_s19 + $0xd0] sm:$0xff]  }
  0x20   : > { %5021 = vmatmul.mubr.msk.bf16.gmra.mxu0 %vm1059_vm2, %v5293_v12  ;;  %5149 = vmatmul.mubr.msk.bf16.gmra.mxu1 %vm1059_vm2, %v5294_v13  ;;  %v5336_v55 = vld [vmem:[%s5461_s19 + $0x2c0] sm:$0xff]   ;;  %v5338_v57 = vld [vmem:[%s5461_s19 + $0x2c8] sm:$0xff]   ;;  %v5340_v59 = vld [vmem:[%s5461_s19 + $0x2d0] sm:$0xff]  }
  0x21   : > { %5024 = vmatprep.mubr.msk.bf16.mxu0 %vm1059_vm2, %v5295_v14  ;;  %5152 = vmatprep.mubr.msk.bf16.mxu1 %vm1059_vm2, %v5296_v15  ;;  %v5341_v60 = vld [vmem:[%s5461_s19 + $0xd8] sm:$0xff]   ;;  %v5343_v62 = vld [vmem:[%s5461_s19 + $0xe0] sm:$0xff]   ;;  %v5345_v0 = vld [vmem:[%s5461_s19 + $0xe8] sm:$0xff]  }
  0x22   : > { %v5342_v61 = vld [vmem:[%s5461_s19 + $0x2d8] sm:$0xff]   ;;  %v5344_v63 = vld [vmem:[%s5461_s19 + $0x2e0] sm:$0xff]   ;;  %v5346_v1 = vld [vmem:[%s5461_s19 + $0x2e8] sm:$0xff]  }
  0x23   : > { %v5347_v2 = vld [vmem:[%s5461_s19 + $0xf0] sm:$0xff]   ;;  %v5349_v4 = vld [vmem:[%s5461_s19 + $0xf8] sm:$0xff]   ;;  %v5351_v6 = vld [vmem:[%s5461_s19 + $0x100] sm:$0xff]  }
  0x24   : > { %v5348_v3 = vld [vmem:[%s5461_s19 + $0x2f0] sm:$0xff]   ;;  %v5350_v5 = vld [vmem:[%s5461_s19 + $0x2f8] sm:$0xff]   ;;  %v5352_v7 = vld [vmem:[%s5461_s19 + $0x300] sm:$0xff]  }
  0x25   : > { %v5353_v8 = vld [vmem:[%s5461_s19 + $0x108] sm:$0xff]   ;;  %v5355_v10 = vld [vmem:[%s5461_s19 + $0x110] sm:$0xff]   ;;  %v5357_v12 = vld [vmem:[%s5461_s19 + $0x118] sm:$0xff]  }
  0x26   : > { %v5354_v9 = vld [vmem:[%s5461_s19 + $0x308] sm:$0xff]   ;;  %v5356_v11 = vld [vmem:[%s5461_s19 + $0x310] sm:$0xff]   ;;  %v5358_v13 = vld [vmem:[%s5461_s19 + $0x318] sm:$0xff]  }
  0x27   : > { %v5359_v14 = vld [vmem:[%s5461_s19 + $0x120] sm:$0xff]  }
  0x28   : > { %5025 = vmatmul.mubr.msk.bf16.gmra.mxu0 %vm1059_vm2, %v5297_v16  ;;  %5153 = vmatmul.mubr.msk.bf16.gmra.mxu1 %vm1059_vm2, %v5298_v17  ;;  %v5360_v15 = vld [vmem:[%s5461_s19 + $0x320] sm:$0xff]   ;;  %v5361_v16 = vld [vmem:[%s5461_s19 + $0x128] sm:$0xff]  }
  0x29   : > { %5028 = vmatprep.mubr.msk.bf16.mxu0 %vm1059_vm2, %v5299_v18  ;;  %5156 = vmatprep.mubr.msk.bf16.mxu1 %vm1059_vm2, %v5300_v19  ;;  %v5362_v17 = vld [vmem:[%s5461_s19 + $0x328] sm:$0xff]   ;;  %v5363_v18 = vld [vmem:[%s5461_s19 + $0x130] sm:$0xff]  }
  0x2a   : > { %v5364_v19 = vld [vmem:[%s5461_s19 + $0x330] sm:$0xff]  }
  0x30   : > { %5029 = vmatmul.mubr.msk.bf16.gmra.mxu0 %vm1059_vm2, %v5301_v20  ;;  %5157 = vmatmul.mubr.msk.bf16.gmra.mxu1 %vm1059_vm2, %v5302_v21  ;;  %v5365_v20 = vld [vmem:[%s5461_s19 + $0x138] sm:$0xff]  }
  0x31   : > { %5032 = vmatprep.mubr.msk.bf16.mxu0 %vm1059_vm2, %v5303_v22  ;;  %5160 = vmatprep.mubr.msk.bf16.mxu1 %vm1059_vm2, %v5304_v23  ;;  %v5366_v21 = vld [vmem:[%s5461_s19 + $0x338] sm:$0xff]   ;;  %v5367_v22 = vld [vmem:[%s5461_s19 + $0x140] sm:$0xff]  }
  0x32   : > { %v5368_v23 = vld [vmem:[%s5461_s19 + $0x340] sm:$0xff]  }
  0x38   : > { %5033 = vmatmul.mubr.msk.bf16.gmra.mxu0 %vm1059_vm2, %v5305_v24  ;;  %5161 = vmatmul.mubr.msk.bf16.gmra.mxu1 %vm1059_vm2, %v5306_v25  ;;  %v5369_v24 = vld [vmem:[%s5461_s19 + $0x148] sm:$0xff]  }
  0x39   : > { %5036 = vmatprep.mubr.msk.bf16.mxu0 %vm1059_vm2, %v5307_v26  ;;  %5164 = vmatprep.mubr.msk.bf16.mxu1 %vm1059_vm2, %v5308_v27  ;;  %v5370_v25 = vld [vmem:[%s5461_s19 + $0x348] sm:$0xff]   ;;  %v5371_v26 = vld [vmem:[%s5461_s19 + $0x150] sm:$0xff]  }
  0x3a   : > { %v5372_v27 = vld [vmem:[%s5461_s19 + $0x350] sm:$0xff]  }
  0x40   : > { %5037 = vmatmul.mubr.msk.bf16.gmra.mxu0 %vm1059_vm2, %v5309_v28  ;;  %5165 = vmatmul.mubr.msk.bf16.gmra.mxu1 %vm1059_vm2, %v5310_v29  ;;  %v5373_v28 = vld [vmem:[%s5461_s19 + $0x158] sm:$0xff]  }
  0x41   : > { %5040 = vmatprep.mubr.msk.bf16.mxu0 %vm1059_vm2, %v5311_v30  ;;  %5168 = vmatprep.mubr.msk.bf16.mxu1 %vm1059_vm2, %v5312_v31  ;;  %v5374_v29 = vld [vmem:[%s5461_s19 + $0x358] sm:$0xff]   ;;  %v5375_v30 = vld [vmem:[%s5461_s19 + $0x160] sm:$0xff]  }
  0x42   : > { %v5376_v31 = vld [vmem:[%s5461_s19 + $0x360] sm:$0xff]  }
  0x48   : > { %5041 = vmatmul.mubr.msk.bf16.gmra.mxu0 %vm1059_vm2, %v5313_v32  ;;  %5169 = vmatmul.mubr.msk.bf16.gmra.mxu1 %vm1059_vm2, %v5314_v33  ;;  %v5377_v32 = vld [vmem:[%s5461_s19 + $0x168] sm:$0xff]  }
  0x49   : > { %5044 = vmatprep.mubr.msk.bf16.mxu0 %vm1059_vm2, %v5315_v34  ;;  %5172 = vmatprep.mubr.msk.bf16.mxu1 %vm1059_vm2, %v5316_v35  ;;  %v5378_v33 = vld [vmem:[%s5461_s19 + $0x368] sm:$0xff]   ;;  %v5379_v34 = vld [vmem:[%s5461_s19 + $0x170] sm:$0xff]  }
  0x4a   : > { %v5380_v35 = vld [vmem:[%s5461_s19 + $0x370] sm:$0xff]  }
  0x50   : > { %5045 = vmatmul.mubr.msk.bf16.gmra.mxu0 %vm1059_vm2, %v5317_v36  ;;  %5173 = vmatmul.mubr.msk.bf16.gmra.mxu1 %vm1059_vm2, %v5318_v37  ;;  %v5381_v36 = vld [vmem:[%s5461_s19 + $0x178] sm:$0xff]  }
  0x51   : > { %5048 = vmatprep.mubr.msk.bf16.mxu0 %vm1059_vm2, %v5319_v38  ;;  %5176 = vmatprep.mubr.msk.bf16.mxu1 %vm1059_vm2, %v5320_v39  ;;  %v5382_v37 = vld [vmem:[%s5461_s19 + $0x378] sm:$0xff]   ;;  %v5383_v38 = vld [vmem:[%s5461_s19 + $0x180] sm:$0xff]  }
  0x52   : > { %v5384_v39 = vld [vmem:[%s5461_s19 + $0x380] sm:$0xff]  }
  0x58   : > { %5049 = vmatmul.mubr.msk.bf16.gmra.mxu0 %vm1059_vm2, %v5321_v40  ;;  %5177 = vmatmul.mubr.msk.bf16.gmra.mxu1 %vm1059_vm2, %v5322_v41  ;;  %v5385_v40 = vld [vmem:[%s5461_s19 + $0x188] sm:$0xff]  }
  0x59   : > { %5052 = vmatprep.mubr.msk.bf16.mxu0 %vm1059_vm2, %v5323_v42  ;;  %5180 = vmatprep.mubr.msk.bf16.mxu1 %vm1059_vm2, %v5324_v43  ;;  %v5386_v41 = vld [vmem:[%s5461_s19 + $0x388] sm:$0xff]   ;;  %v5387_v42 = vld [vmem:[%s5461_s19 + $0x190] sm:$0xff]  }
  0x5a   : > { %v5388_v43 = vld [vmem:[%s5461_s19 + $0x390] sm:$0xff]  }
  0x60   : > { %5053 = vmatmul.mubr.msk.bf16.gmra.mxu0 %vm1059_vm2, %v5325_v44  ;;  %5181 = vmatmul.mubr.msk.bf16.gmra.mxu1 %vm1059_vm2, %v5326_v45 }
  0x61   : > { %5056 = vmatprep.mubr.msk.bf16.mxu0 %vm1059_vm2, %v5327_v46  ;;  %5184 = vmatprep.mubr.msk.bf16.mxu1 %vm1059_vm2, %v5328_v47 }
  0x68   : > { %5057 = vmatmul.mubr.msk.bf16.gmra.mxu0 %vm1059_vm2, %v5329_v48  ;;  %5185 = vmatmul.mubr.msk.bf16.gmra.mxu1 %vm1059_vm2, %v5330_v49 }
  0x69   : > { %5060 = vmatprep.mubr.msk.bf16.mxu0 %vm1059_vm2, %v5331_v50  ;;  %5188 = vmatprep.mubr.msk.bf16.mxu1 %vm1059_vm2, %v5332_v51 }
  0x70   : > { %5061 = vmatmul.mubr.msk.bf16.gmra.mxu0 %vm1059_vm2, %v5333_v52  ;;  %5189 = vmatmul.mubr.msk.bf16.gmra.mxu1 %vm1059_vm2, %v5334_v53 }
  0x71   : > { %5064 = vmatprep.mubr.msk.bf16.mxu0 %vm1059_vm2, %v5335_v54  ;;  %5192 = vmatprep.mubr.msk.bf16.mxu1 %vm1059_vm2, %v5336_v55 }
  0x78   : > { %5065 = vmatmul.mubr.msk.bf16.gmra.mxu0 %vm1059_vm2, %v5337_v56  ;;  %5193 = vmatmul.mubr.msk.bf16.gmra.mxu1 %vm1059_vm2, %v5338_v57  ;;  %v5389_v56 = vld [vmem:[%s5461_s19 + $0x198] sm:$0xff]  }
  0x79   : > { %5068 = vmatprep.mubr.msk.bf16.mxu0 %vm1059_vm2, %v5339_v58  ;;  %5196 = vmatprep.mubr.msk.bf16.mxu1 %vm1059_vm2, %v5340_v59  ;;  %v5390_v57 = vld [vmem:[%s5461_s19 + $0x398] sm:$0xff]  }
  0x80   : > { %5069 = vmatmul.mubr.msk.bf16.gmra.mxu0 %vm1059_vm2, %v5341_v60  ;;  %5197 = vmatmul.mubr.msk.bf16.gmra.mxu1 %vm1059_vm2, %v5342_v61 }
  0x81   : > { %5072 = vmatprep.mubr.msk.bf16.mxu0 %vm1059_vm2, %v5343_v62  ;;  %5200 = vmatprep.mubr.msk.bf16.mxu1 %vm1059_vm2, %v5344_v63  ;;  %v5391_v62 = vld [vmem:[%s5461_s19 + $0x1a0] sm:$0xff]  }
  0x82   : > { %v5392_v63 = vld [vmem:[%s5461_s19 + $0x3a0] sm:$0xff]  }
  0x88   : > { %5073 = vmatmul.mubr.msk.bf16.gmra.mxu0 %vm1059_vm2, %v5345_v0  ;;  %5201 = vmatmul.mubr.msk.bf16.gmra.mxu1 %vm1059_vm2, %v5346_v1 }
  0x89   : > { %5076 = vmatprep.mubr.msk.bf16.mxu0 %vm1059_vm2, %v5347_v2  ;;  %5204 = vmatprep.mubr.msk.bf16.mxu1 %vm1059_vm2, %v5348_v3 }
  0x90   : > { %5077 = vmatmul.mubr.msk.bf16.gmra.mxu0 %vm1059_vm2, %v5349_v4  ;;  %5205 = vmatmul.mubr.msk.bf16.gmra.mxu1 %vm1059_vm2, %v5350_v5 }
  0x91   : > { %5080 = vmatprep.mubr.msk.bf16.mxu0 %vm1059_vm2, %v5351_v6  ;;  %5208 = vmatprep.mubr.msk.bf16.mxu1 %vm1059_vm2, %v5352_v7 }
  0x98   : > { %5081 = vmatmul.mubr.msk.bf16.gmra.mxu0 %vm1059_vm2, %v5353_v8  ;;  %5209 = vmatmul.mubr.msk.bf16.gmra.mxu1 %vm1059_vm2, %v5354_v9 }
  0x99   : > { %5084 = vmatprep.mubr.msk.bf16.mxu0 %vm1059_vm2, %v5355_v10  ;;  %5212 = vmatprep.mubr.msk.bf16.mxu1 %vm1059_vm2, %v5356_v11 }
  0xa0   : > { %5085 = vmatmul.mubr.msk.bf16.gmra.mxu0 %vm1059_vm2, %v5357_v12  ;;  %5213 = vmatmul.mubr.msk.bf16.gmra.mxu1 %vm1059_vm2, %v5358_v13 }
  0xa1   : > { %5088 = vmatprep.mubr.msk.bf16.mxu0 %vm1059_vm2, %v5359_v14  ;;  %5216 = vmatprep.mubr.msk.bf16.mxu1 %vm1059_vm2, %v5360_v15 }
  0xa8   : > { %5089 = vmatmul.mubr.msk.bf16.gmra.mxu0 %vm1059_vm2, %v5361_v16  ;;  %5217 = vmatmul.mubr.msk.bf16.gmra.mxu1 %vm1059_vm2, %v5362_v17 }
  0xa9   : > { %5092 = vmatprep.mubr.msk.bf16.mxu0 %vm1059_vm2, %v5363_v18  ;;  %5220 = vmatprep.mubr.msk.bf16.mxu1 %vm1059_vm2, %v5364_v19 }
  0xb0   : > { %5093 = vmatmul.mubr.msk.bf16.gmra.mxu0 %vm1059_vm2, %v5365_v20  ;;  %5221 = vmatmul.mubr.msk.bf16.gmra.mxu1 %vm1059_vm2, %v5366_v21  ;;  %v5393_v20 = vld [vmem:[%s5461_s19 + $0x1a8] sm:$0xff]  }
  0xb1   : > { %5096 = vmatprep.mubr.msk.bf16.mxu0 %vm1059_vm2, %v5367_v22  ;;  %5224 = vmatprep.mubr.msk.bf16.mxu1 %vm1059_vm2, %v5368_v23  ;;  %v5394_v21 = vld [vmem:[%s5461_s19 + $0x3a8] sm:$0xff]  }
  0xb8   : > { %5097 = vmatmul.mubr.msk.bf16.gmra.mxu0 %vm1059_vm2, %v5369_v24  ;;  %5225 = vmatmul.mubr.msk.bf16.gmra.mxu1 %vm1059_vm2, %v5370_v25 }
  0xb9   : > { %5100 = vmatprep.mubr.msk.bf16.mxu0 %vm1059_vm2, %v5371_v26  ;;  %5228 = vmatprep.mubr.msk.bf16.mxu1 %vm1059_vm2, %v5372_v27  ;;  %v5395_v26 = vld [vmem:[%s5461_s19 + $0x1b0] sm:$0xff]  }
  0xba   : > { %v5396_v27 = vld [vmem:[%s5461_s19 + $0x3b0] sm:$0xff]  }
  0xc0   : > { %5101 = vmatmul.mubr.msk.bf16.gmra.mxu0 %vm1059_vm2, %v5373_v28  ;;  %5229 = vmatmul.mubr.msk.bf16.gmra.mxu1 %vm1059_vm2, %v5374_v29 }
  0xc1   : > { %5104 = vmatprep.mubr.msk.bf16.mxu0 %vm1059_vm2, %v5375_v30  ;;  %5232 = vmatprep.mubr.msk.bf16.mxu1 %vm1059_vm2, %v5376_v31 }
  0xc8   : > { %5105 = vmatmul.mubr.msk.bf16.gmra.mxu0 %vm1059_vm2, %v5377_v32  ;;  %5233 = vmatmul.mubr.msk.bf16.gmra.mxu1 %vm1059_vm2, %v5378_v33 }
  0xc9   : > { %5108 = vmatprep.mubr.msk.bf16.mxu0 %vm1059_vm2, %v5379_v34  ;;  %5236 = vmatprep.mubr.msk.bf16.mxu1 %vm1059_vm2, %v5380_v35 }
  0xd0   : > { %5109 = vmatmul.mubr.msk.bf16.gmra.mxu0 %vm1059_vm2, %v5381_v36  ;;  %5237 = vmatmul.mubr.msk.bf16.gmra.mxu1 %vm1059_vm2, %v5382_v37 }
  0xd1   : > { %5112 = vmatprep.mubr.msk.bf16.mxu0 %vm1059_vm2, %v5383_v38  ;;  %5240 = vmatprep.mubr.msk.bf16.mxu1 %vm1059_vm2, %v5384_v39 }
  0xd8   : > { %v5018_v44 = vpop.f32.mrf.mxu0  ;;  %5113 = vmatmul.mubr.msk.bf16.gmra.mxu0 %vm1059_vm2, %v5385_v40  ;;  %v5146_v45 = vpop.f32.mrf.mxu1  ;;  %5241 = vmatmul.mubr.msk.bf16.gmra.mxu1 %vm1059_vm2, %v5386_v41 }
  0xd9   : > { %v2510_v46 = vmax.f32 %v5018_v44, 0.0  ;;  %v2638_v47 = vmax.f32 %v5146_v45, 0.0  ;;  %5116 = vmatprep.mubr.msk.bf16.mxu0 %vm1059_vm2, %v5387_v42  ;;  %5244 = vmatprep.mubr.msk.bf16.mxu1 %vm1059_vm2, %v5388_v43 }
  0xda   : > { %v1485_v48 = vpop.f32.mrf.mxu0  ;;  %v1997_v49 = vpop.f32.mrf.mxu1 }
  0xdb   : > { %v4628_v50 = vpack.c.bf16 %v2510_v46, %v2510_v46  ;;  %v4756_v51 = vpack.c.bf16 %v2638_v47, %v2638_v47  ;;  %v2508_v52 = vmax.f32 %v1485_v48, 0.0  ;;  %v2636_v53 = vmax.f32 %v1997_v49, 0.0  ;;  %v5397_v48 = vld [vmem:[%s5461_s19 + $0x1b8] sm:$0xff]  }
  0xdc   : > { %v5019_v54 = vpop.f32.mrf.mxu0  ;;  %v5147_v55 = vpop.f32.mrf.mxu1  ;;  %v5398_v49 = vld [vmem:[%s5461_s19 + $0x3b8] sm:$0xff]  }
  0xdd   : > { %3791 = vst.msk [vmem:[%s5672_s22 + $0x8] sm:$0xf] %vm3788_vm3, %v4628_v50  ;;  %3919 = vst.msk [vmem:[%s5672_s22 + $0x208] sm:$0xf] %vm3788_vm3, %v4756_v51  ;;  %v4626_v58 = vpack.c.bf16 %v2508_v52, %v2508_v52  ;;  %v4754_v59 = vpack.c.bf16 %v2636_v53, %v2636_v53  ;;  %v2511_v60 = vmax.f32 %v5019_v54, 0.0  ;;  %v2639_v61 = vmax.f32 %v5147_v55, 0.0 }
  0xde   : > { %v1488_v0 = vpop.f32.mrf.mxu0  ;;  %v2000_v1 = vpop.f32.mrf.mxu1  ;;  %v5399_v54 = vld [vmem:[%s5461_s19 + $0x1c0] sm:$0xff]  }
  0xdf   : > { %3789 = vst.msk [vmem:[%s5672_s22] sm:$0xf] %vm3788_vm3, %v4626_v58  ;;  %3917 = vst.msk [vmem:[%s5672_s22 + $0x200] sm:$0xf] %vm3788_vm3, %v4754_v59  ;;  %v4629_v2 = vpack.c.bf16 %v2511_v60, %v2511_v60  ;;  %v4757_v3 = vpack.c.bf16 %v2639_v61, %v2639_v61  ;;  %v2509_v4 = vmax.f32 %v1488_v0, 0.0  ;;  %v2637_v5 = vmax.f32 %v2000_v1, 0.0 }
  0xe0   : > { %v5022_v6 = vpop.f32.mrf.mxu0  ;;  %5117 = vmatmul.mubr.msk.bf16.gmra.mxu0 %vm1059_vm2, %v5389_v56  ;;  %v5150_v7 = vpop.f32.mrf.mxu1  ;;  %5245 = vmatmul.mubr.msk.bf16.gmra.mxu1 %vm1059_vm2, %v5390_v57  ;;  %v5400_v55 = vld [vmem:[%s5461_s19 + $0x3c0] sm:$0xff]  }
  0xe1   : > { %3792 = vst.msk [vmem:[%s5672_s22 + $0xc] sm:$0xf] %vm3788_vm3, %v4629_v2  ;;  %3920 = vst.msk [vmem:[%s5672_s22 + $0x20c] sm:$0xf] %vm3788_vm3, %v4757_v3  ;;  %v4627_v8 = vpack.c.bf16 %v2509_v4, %v2509_v4  ;;  %v4755_v9 = vpack.c.bf16 %v2637_v5, %v2637_v5  ;;  %v2514_v10 = vmax.f32 %v5022_v6, 0.0  ;;  %v2642_v11 = vmax.f32 %v5150_v7, 0.0  ;;  %5120 = vmatprep.mubr.msk.bf16.mxu0 %vm1059_vm2, %v5391_v62 }
  0xe2   : > { %5248 = vmatprep.mubr.msk.bf16.mxu1 %vm1059_vm2, %v5392_v63  ;;  %v1501_v12 = vpop.f32.mrf.mxu0  ;;  %v2013_v13 = vpop.f32.mrf.mxu1 }
  0xe3   : > { %3790 = vst.msk [vmem:[%s5672_s22 + $0x4] sm:$0xf] %vm3788_vm3, %v4627_v8  ;;  %3918 = vst.msk [vmem:[%s5672_s22 + $0x204] sm:$0xf] %vm3788_vm3, %v4755_v9  ;;  %v4632_v14 = vpack.c.bf16 %v2514_v10, %v2514_v10  ;;  %v4760_v15 = vpack.c.bf16 %v2642_v11, %v2642_v11  ;;  %v2512_v16 = vmax.f32 %v1501_v12, 0.0  ;;  %v2640_v17 = vmax.f32 %v2013_v13, 0.0 }
  0xe4   : > { %v5023_v18 = vpop.f32.mrf.mxu0  ;;  %v5151_v19 = vpop.f32.mrf.mxu1  ;;  %v5401_v12 = vld [vmem:[%s5461_s19 + $0x1c8] sm:$0xff]  }
  0xe5   : > { %3795 = vst.msk [vmem:[%s5672_s22 + $0x18] sm:$0xf] %vm3788_vm3, %v4632_v14  ;;  %3923 = vst.msk [vmem:[%s5672_s22 + $0x218] sm:$0xf] %vm3788_vm3, %v4760_v15  ;;  %v4630_v22 = vpack.c.bf16 %v2512_v16, %v2512_v16  ;;  %v4758_v23 = vpack.c.bf16 %v2640_v17, %v2640_v17  ;;  %v2515_v24 = vmax.f32 %v5023_v18, 0.0  ;;  %v2643_v25 = vmax.f32 %v5151_v19, 0.0 }
  0xe6   : > { %v1504_v28 = vpop.f32.mrf.mxu0  ;;  %v2016_v29 = vpop.f32.mrf.mxu1  ;;  %v5402_v13 = vld [vmem:[%s5461_s19 + $0x3c8] sm:$0xff]   ;;  %v5403_v18 = vld [vmem:[%s5461_s19 + $0x1d0] sm:$0xff]  }
  0xe7   : > { %3793 = vst.msk [vmem:[%s5672_s22 + $0x10] sm:$0xf] %vm3788_vm3, %v4630_v22  ;;  %3921 = vst.msk [vmem:[%s5672_s22 + $0x210] sm:$0xf] %vm3788_vm3, %v4758_v23  ;;  %v4633_v30 = vpack.c.bf16 %v2515_v24, %v2515_v24  ;;  %v4761_v31 = vpack.c.bf16 %v2643_v25, %v2643_v25  ;;  %v2513_v32 = vmax.f32 %v1504_v28, 0.0  ;;  %v2641_v33 = vmax.f32 %v2016_v29, 0.0 }
  0xe8   : > { %v5026_v34 = vpop.f32.mrf.mxu0  ;;  %5121 = vmatmul.mubr.msk.bf16.gmra.mxu0 %vm1059_vm2, %v5393_v20  ;;  %v5154_v35 = vpop.f32.mrf.mxu1  ;;  %5249 = vmatmul.mubr.msk.bf16.gmra.mxu1 %vm1059_vm2, %v5394_v21  ;;  %v5404_v19 = vld [vmem:[%s5461_s19 + $0x3d0] sm:$0xff]  }
  0xe9   : > { %3796 = vst.msk [vmem:[%s5672_s22 + $0x1c] sm:$0xf] %vm3788_vm3, %v4633_v30  ;;  %3924 = vst.msk [vmem:[%s5672_s22 + $0x21c] sm:$0xf] %vm3788_vm3, %v4761_v31  ;;  %v4631_v36 = vpack.c.bf16 %v2513_v32, %v2513_v32  ;;  %v4759_v37 = vpack.c.bf16 %v2641_v33, %v2641_v33  ;;  %v2518_v38 = vmax.f32 %v5026_v34, 0.0  ;;  %v2646_v39 = vmax.f32 %v5154_v35, 0.0  ;;  %5124 = vmatprep.mubr.msk.bf16.mxu0 %vm1059_vm2, %v5395_v26 }
  0xea   : > { %5252 = vmatprep.mubr.msk.bf16.mxu1 %vm1059_vm2, %v5396_v27  ;;  %v1517_v40 = vpop.f32.mrf.mxu0  ;;  %v2029_v41 = vpop.f32.mrf.mxu1 }
  0xeb   : > { %3794 = vst.msk [vmem:[%s5672_s22 + $0x14] sm:$0xf] %vm3788_vm3, %v4631_v36  ;;  %3922 = vst.msk [vmem:[%s5672_s22 + $0x214] sm:$0xf] %vm3788_vm3, %v4759_v37  ;;  %v4636_v42 = vpack.c.bf16 %v2518_v38, %v2518_v38  ;;  %v4764_v43 = vpack.c.bf16 %v2646_v39, %v2646_v39  ;;  %v2516_v44 = vmax.f32 %v1517_v40, 0.0  ;;  %v2644_v45 = vmax.f32 %v2029_v41, 0.0 }
  0xec   : > { %v5027_v46 = vpop.f32.mrf.mxu0  ;;  %v5155_v47 = vpop.f32.mrf.mxu1  ;;  %v5405_v40 = vld [vmem:[%s5461_s19 + $0x1d8] sm:$0xff]  }
  0xed   : > { %3799 = vst.msk [vmem:[%s5672_s22 + $0x28] sm:$0xf] %vm3788_vm3, %v4636_v42  ;;  %3927 = vst.msk [vmem:[%s5672_s22 + $0x228] sm:$0xf] %vm3788_vm3, %v4764_v43  ;;  %v4634_v50 = vpack.c.bf16 %v2516_v44, %v2516_v44  ;;  %v4762_v51 = vpack.c.bf16 %v2644_v45, %v2644_v45  ;;  %v2519_v52 = vmax.f32 %v5027_v46, 0.0  ;;  %v2647_v53 = vmax.f32 %v5155_v47, 0.0 }
  0xee   : > { %v1520_v56 = vpop.f32.mrf.mxu0  ;;  %v2032_v57 = vpop.f32.mrf.mxu1  ;;  %v5406_v41 = vld [vmem:[%s5461_s19 + $0x3d8] sm:$0xff]   ;;  %v5407_v46 = vld [vmem:[%s5461_s19 + $0x1e0] sm:$0xff]  }
  0xef   : > { %3797 = vst.msk [vmem:[%s5672_s22 + $0x20] sm:$0xf] %vm3788_vm3, %v4634_v50  ;;  %3925 = vst.msk [vmem:[%s5672_s22 + $0x220] sm:$0xf] %vm3788_vm3, %v4762_v51  ;;  %v4637_v58 = vpack.c.bf16 %v2519_v52, %v2519_v52  ;;  %v4765_v59 = vpack.c.bf16 %v2647_v53, %v2647_v53  ;;  %v2517_v60 = vmax.f32 %v1520_v56, 0.0  ;;  %v2645_v61 = vmax.f32 %v2032_v57, 0.0 }
  0xf0   : > { %v5030_v62 = vpop.f32.mrf.mxu0  ;;  %5125 = vmatmul.mubr.msk.bf16.gmra.mxu0 %vm1059_vm2, %v5397_v48  ;;  %v5158_v63 = vpop.f32.mrf.mxu1  ;;  %5253 = vmatmul.mubr.msk.bf16.gmra.mxu1 %vm1059_vm2, %v5398_v49  ;;  %v5408_v47 = vld [vmem:[%s5461_s19 + $0x3e0] sm:$0xff]  }
  0xf1   : > { %3800 = vst.msk [vmem:[%s5672_s22 + $0x2c] sm:$0xf] %vm3788_vm3, %v4637_v58  ;;  %3928 = vst.msk [vmem:[%s5672_s22 + $0x22c] sm:$0xf] %vm3788_vm3, %v4765_v59  ;;  %v4635_v0 = vpack.c.bf16 %v2517_v60, %v2517_v60  ;;  %v4763_v1 = vpack.c.bf16 %v2645_v61, %v2645_v61  ;;  %v2522_v2 = vmax.f32 %v5030_v62, 0.0  ;;  %v2650_v3 = vmax.f32 %v5158_v63, 0.0  ;;  %5128 = vmatprep.mubr.msk.bf16.mxu0 %vm1059_vm2, %v5399_v54 }
  0xf2   : > { %5256 = vmatprep.mubr.msk.bf16.mxu1 %vm1059_vm2, %v5400_v55  ;;  %v1533_v4 = vpop.f32.mrf.mxu0  ;;  %v2045_v5 = vpop.f32.mrf.mxu1 }
  0xf3   : > { %3798 = vst.msk [vmem:[%s5672_s22 + $0x24] sm:$0xf] %vm3788_vm3, %v4635_v0  ;;  %3926 = vst.msk [vmem:[%s5672_s22 + $0x224] sm:$0xf] %vm3788_vm3, %v4763_v1  ;;  %v4640_v6 = vpack.c.bf16 %v2522_v2, %v2522_v2  ;;  %v4768_v7 = vpack.c.bf16 %v2650_v3, %v2650_v3  ;;  %v2520_v8 = vmax.f32 %v1533_v4, 0.0  ;;  %v2648_v9 = vmax.f32 %v2045_v5, 0.0 }
  0xf4   : > { %v5031_v10 = vpop.f32.mrf.mxu0  ;;  %v5159_v11 = vpop.f32.mrf.mxu1  ;;  %v5409_v4 = vld [vmem:[%s5461_s19 + $0x1e8] sm:$0xff]  }
  0xf5   : > { %3803 = vst.msk [vmem:[%s5672_s22 + $0x38] sm:$0xf] %vm3788_vm3, %v4640_v6  ;;  %3931 = vst.msk [vmem:[%s5672_s22 + $0x238] sm:$0xf] %vm3788_vm3, %v4768_v7  ;;  %v4638_v14 = vpack.c.bf16 %v2520_v8, %v2520_v8  ;;  %v4766_v15 = vpack.c.bf16 %v2648_v9, %v2648_v9  ;;  %v2523_v16 = vmax.f32 %v5031_v10, 0.0  ;;  %v2651_v17 = vmax.f32 %v5159_v11, 0.0 }
  0xf6   : > { %v1536_v20 = vpop.f32.mrf.mxu0  ;;  %v2048_v21 = vpop.f32.mrf.mxu1  ;;  %v5410_v5 = vld [vmem:[%s5461_s19 + $0x3e8] sm:$0xff]   ;;  %v5411_v10 = vld [vmem:[%s5461_s19 + $0x1f0] sm:$0xff]  }
  0xf7   : > { %3801 = vst.msk [vmem:[%s5672_s22 + $0x30] sm:$0xf] %vm3788_vm3, %v4638_v14  ;;  %3929 = vst.msk [vmem:[%s5672_s22 + $0x230] sm:$0xf] %vm3788_vm3, %v4766_v15  ;;  %v4641_v22 = vpack.c.bf16 %v2523_v16, %v2523_v16  ;;  %v4769_v23 = vpack.c.bf16 %v2651_v17, %v2651_v17  ;;  %v2521_v24 = vmax.f32 %v1536_v20, 0.0  ;;  %v2649_v25 = vmax.f32 %v2048_v21, 0.0 }
  0xf8   : > { %v5034_v26 = vpop.f32.mrf.mxu0  ;;  %5129 = vmatmul.mubr.msk.bf16.gmra.mxu0 %vm1059_vm2, %v5401_v12  ;;  %v5162_v27 = vpop.f32.mrf.mxu1  ;;  %5257 = vmatmul.mubr.msk.bf16.gmra.mxu1 %vm1059_vm2, %v5402_v13  ;;  %v5412_v11 = vld [vmem:[%s5461_s19 + $0x3f0] sm:$0xff]  }
  0xf9   : > { %3804 = vst.msk [vmem:[%s5672_s22 + $0x3c] sm:$0xf] %vm3788_vm3, %v4641_v22  ;;  %3932 = vst.msk [vmem:[%s5672_s22 + $0x23c] sm:$0xf] %vm3788_vm3, %v4769_v23  ;;  %v4639_v28 = vpack.c.bf16 %v2521_v24, %v2521_v24  ;;  %v4767_v29 = vpack.c.bf16 %v2649_v25, %v2649_v25  ;;  %v2526_v30 = vmax.f32 %v5034_v26, 0.0  ;;  %v2654_v31 = vmax.f32 %v5162_v27, 0.0  ;;  %5132 = vmatprep.mubr.msk.bf16.mxu0 %vm1059_vm2, %v5403_v18 }
  0xfa   : > { %5260 = vmatprep.mubr.msk.bf16.mxu1 %vm1059_vm2, %v5404_v19  ;;  %v1549_v32 = vpop.f32.mrf.mxu0  ;;  %v2061_v33 = vpop.f32.mrf.mxu1 }
  0xfb   : > { %3802 = vst.msk [vmem:[%s5672_s22 + $0x34] sm:$0xf] %vm3788_vm3, %v4639_v28  ;;  %3930 = vst.msk [vmem:[%s5672_s22 + $0x234] sm:$0xf] %vm3788_vm3, %v4767_v29  ;;  %v4644_v34 = vpack.c.bf16 %v2526_v30, %v2526_v30  ;;  %v4772_v35 = vpack.c.bf16 %v2654_v31, %v2654_v31  ;;  %v2524_v36 = vmax.f32 %v1549_v32, 0.0  ;;  %v2652_v37 = vmax.f32 %v2061_v33, 0.0 }
  0xfc   : > { %v5035_v38 = vpop.f32.mrf.mxu0  ;;  %v5163_v39 = vpop.f32.mrf.mxu1  ;;  %v5413_v32 = vld [vmem:[%s5461_s19 + $0x1f8] sm:$0xff]  }
  0xfd   : > { %3807 = vst.msk [vmem:[%s5672_s22 + $0x48] sm:$0xf] %vm3788_vm3, %v4644_v34  ;;  %3935 = vst.msk [vmem:[%s5672_s22 + $0x248] sm:$0xf] %vm3788_vm3, %v4772_v35  ;;  %v4642_v42 = vpack.c.bf16 %v2524_v36, %v2524_v36  ;;  %v4770_v43 = vpack.c.bf16 %v2652_v37, %v2652_v37  ;;  %v2527_v44 = vmax.f32 %v5035_v38, 0.0  ;;  %v2655_v45 = vmax.f32 %v5163_v39, 0.0 }
  0xfe   : > { %v1552_v48 = vpop.f32.mrf.mxu0  ;;  %v2064_v49 = vpop.f32.mrf.mxu1  ;;  %v5414_v33 = vld [vmem:[%s5461_s19 + $0x3f8] sm:$0xff]  }
  0xff   : > { %3805 = vst.msk [vmem:[%s5672_s22 + $0x40] sm:$0xf] %vm3788_vm3, %v4642_v42  ;;  %3933 = vst.msk [vmem:[%s5672_s22 + $0x240] sm:$0xf] %vm3788_vm3, %v4770_v43  ;;  %v4645_v50 = vpack.c.bf16 %v2527_v44, %v2527_v44  ;;  %v4773_v51 = vpack.c.bf16 %v2655_v45, %v2655_v45  ;;  %v2525_v52 = vmax.f32 %v1552_v48, 0.0  ;;  %v2653_v53 = vmax.f32 %v2064_v49, 0.0 }
 0x100   : > { %v5038_v54 = vpop.f32.mrf.mxu0  ;;  %5133 = vmatmul.mubr.msk.bf16.gmra.mxu0 %vm1059_vm2, %v5405_v40  ;;  %v5166_v55 = vpop.f32.mrf.mxu1  ;;  %5261 = vmatmul.mubr.msk.bf16.gmra.mxu1 %vm1059_vm2, %v5406_v41 }
 0x101   : > { %3808 = vst.msk [vmem:[%s5672_s22 + $0x4c] sm:$0xf] %vm3788_vm3, %v4645_v50  ;;  %3936 = vst.msk [vmem:[%s5672_s22 + $0x24c] sm:$0xf] %vm3788_vm3, %v4773_v51  ;;  %v4643_v56 = vpack.c.bf16 %v2525_v52, %v2525_v52  ;;  %v4771_v57 = vpack.c.bf16 %v2653_v53, %v2653_v53  ;;  %v2530_v58 = vmax.f32 %v5038_v54, 0.0  ;;  %v2658_v59 = vmax.f32 %v5166_v55, 0.0  ;;  %5136 = vmatprep.mubr.msk.bf16.mxu0 %vm1059_vm2, %v5407_v46 }
 0x102   : > { %5264 = vmatprep.mubr.msk.bf16.mxu1 %vm1059_vm2, %v5408_v47  ;;  %v1565_v60 = vpop.f32.mrf.mxu0  ;;  %v2077_v61 = vpop.f32.mrf.mxu1 }
 0x103   : > { %3806 = vst.msk [vmem:[%s5672_s22 + $0x44] sm:$0xf] %vm3788_vm3, %v4643_v56  ;;  %3934 = vst.msk [vmem:[%s5672_s22 + $0x244] sm:$0xf] %vm3788_vm3, %v4771_v57  ;;  %v4648_v62 = vpack.c.bf16 %v2530_v58, %v2530_v58  ;;  %v4776_v63 = vpack.c.bf16 %v2658_v59, %v2658_v59  ;;  %v2528_v0 = vmax.f32 %v1565_v60, 0.0  ;;  %v2656_v1 = vmax.f32 %v2077_v61, 0.0 }
 0x104   : > { %v5039_v2 = vpop.f32.mrf.mxu0  ;;  %v5167_v3 = vpop.f32.mrf.mxu1 }
 0x105   : > { %3811 = vst.msk [vmem:[%s5672_s22 + $0x58] sm:$0xf] %vm3788_vm3, %v4648_v62  ;;  %3939 = vst.msk [vmem:[%s5672_s22 + $0x258] sm:$0xf] %vm3788_vm3, %v4776_v63  ;;  %v4646_v6 = vpack.c.bf16 %v2528_v0, %v2528_v0  ;;  %v4774_v7 = vpack.c.bf16 %v2656_v1, %v2656_v1  ;;  %v2531_v8 = vmax.f32 %v5039_v2, 0.0  ;;  %v2659_v9 = vmax.f32 %v5167_v3, 0.0 }
 0x106   : > { %v1568_v12 = vpop.f32.mrf.mxu0  ;;  %v2080_v13 = vpop.f32.mrf.mxu1 }
 0x107   : > { %3809 = vst.msk [vmem:[%s5672_s22 + $0x50] sm:$0xf] %vm3788_vm3, %v4646_v6  ;;  %3937 = vst.msk [vmem:[%s5672_s22 + $0x250] sm:$0xf] %vm3788_vm3, %v4774_v7  ;;  %v4649_v14 = vpack.c.bf16 %v2531_v8, %v2531_v8  ;;  %v4777_v15 = vpack.c.bf16 %v2659_v9, %v2659_v9  ;;  %v2529_v16 = vmax.f32 %v1568_v12, 0.0  ;;  %v2657_v17 = vmax.f32 %v2080_v13, 0.0 }
 0x108   : > { %v5042_v18 = vpop.f32.mrf.mxu0  ;;  %5137 = vmatmul.mubr.msk.bf16.gmra.mxu0 %vm1059_vm2, %v5409_v4  ;;  %v5170_v19 = vpop.f32.mrf.mxu1  ;;  %5265 = vmatmul.mubr.msk.bf16.gmra.mxu1 %vm1059_vm2, %v5410_v5 }
 0x109   : > { %3812 = vst.msk [vmem:[%s5672_s22 + $0x5c] sm:$0xf] %vm3788_vm3, %v4649_v14  ;;  %3940 = vst.msk [vmem:[%s5672_s22 + $0x25c] sm:$0xf] %vm3788_vm3, %v4777_v15  ;;  %v4647_v20 = vpack.c.bf16 %v2529_v16, %v2529_v16  ;;  %v4775_v21 = vpack.c.bf16 %v2657_v17, %v2657_v17  ;;  %v2534_v22 = vmax.f32 %v5042_v18, 0.0  ;;  %v2662_v23 = vmax.f32 %v5170_v19, 0.0  ;;  %5140 = vmatprep.mubr.msk.bf16.mxu0 %vm1059_vm2, %v5411_v10 }
 0x10a   : > { %5268 = vmatprep.mubr.msk.bf16.mxu1 %vm1059_vm2, %v5412_v11  ;;  %v1581_v24 = vpop.f32.mrf.mxu0  ;;  %v2093_v25 = vpop.f32.mrf.mxu1 }
 0x10b   : > { %3810 = vst.msk [vmem:[%s5672_s22 + $0x54] sm:$0xf] %vm3788_vm3, %v4647_v20  ;;  %3938 = vst.msk [vmem:[%s5672_s22 + $0x254] sm:$0xf] %vm3788_vm3, %v4775_v21  ;;  %v4652_v26 = vpack.c.bf16 %v2534_v22, %v2534_v22  ;;  %v4780_v27 = vpack.c.bf16 %v2662_v23, %v2662_v23  ;;  %v2532_v28 = vmax.f32 %v1581_v24, 0.0  ;;  %v2660_v29 = vmax.f32 %v2093_v25, 0.0 }
 0x10c   : > { %v5043_v30 = vpop.f32.mrf.mxu0  ;;  %v5171_v31 = vpop.f32.mrf.mxu1 }
 0x10d   : > { %3815 = vst.msk [vmem:[%s5672_s22 + $0x68] sm:$0xf] %vm3788_vm3, %v4652_v26  ;;  %3943 = vst.msk [vmem:[%s5672_s22 + $0x268] sm:$0xf] %vm3788_vm3, %v4780_v27  ;;  %v4650_v34 = vpack.c.bf16 %v2532_v28, %v2532_v28  ;;  %v4778_v35 = vpack.c.bf16 %v2660_v29, %v2660_v29  ;;  %v2535_v36 = vmax.f32 %v5043_v30, 0.0  ;;  %v2663_v37 = vmax.f32 %v5171_v31, 0.0 }
 0x10e   : > { %v1584_v38 = vpop.f32.mrf.mxu0  ;;  %v2096_v39 = vpop.f32.mrf.mxu1 }
 0x10f   : > { %3813 = vst.msk [vmem:[%s5672_s22 + $0x60] sm:$0xf] %vm3788_vm3, %v4650_v34  ;;  %3941 = vst.msk [vmem:[%s5672_s22 + $0x260] sm:$0xf] %vm3788_vm3, %v4778_v35  ;;  %v4653_v40 = vpack.c.bf16 %v2535_v36, %v2535_v36  ;;  %v4781_v41 = vpack.c.bf16 %v2663_v37, %v2663_v37  ;;  %v2533_v42 = vmax.f32 %v1584_v38, 0.0  ;;  %v2661_v43 = vmax.f32 %v2096_v39, 0.0 }
 0x110   : > { %v5046_v44 = vpop.f32.mrf.mxu0  ;;  %5141 = vmatmul.mubr.msk.bf16.gmra.mxu0 %vm1059_vm2, %v5413_v32  ;;  %v5174_v45 = vpop.f32.mrf.mxu1  ;;  %5269 = vmatmul.mubr.msk.bf16.gmra.mxu1 %vm1059_vm2, %v5414_v33 }
 0x111   : > { %3816 = vst.msk [vmem:[%s5672_s22 + $0x6c] sm:$0xf] %vm3788_vm3, %v4653_v40  ;;  %3944 = vst.msk [vmem:[%s5672_s22 + $0x26c] sm:$0xf] %vm3788_vm3, %v4781_v41  ;;  %v4651_v46 = vpack.c.bf16 %v2533_v42, %v2533_v42  ;;  %v4779_v47 = vpack.c.bf16 %v2661_v43, %v2661_v43  ;;  %v2538_v48 = vmax.f32 %v5046_v44, 0.0  ;;  %v2666_v49 = vmax.f32 %v5174_v45, 0.0 }
 0x112   : > { %v1597_v50 = vpop.f32.mrf.mxu0  ;;  %v2109_v51 = vpop.f32.mrf.mxu1 }
 0x113   : > { %3814 = vst.msk [vmem:[%s5672_s22 + $0x64] sm:$0xf] %vm3788_vm3, %v4651_v46  ;;  %3942 = vst.msk [vmem:[%s5672_s22 + $0x264] sm:$0xf] %vm3788_vm3, %v4779_v47  ;;  %v4656_v52 = vpack.c.bf16 %v2538_v48, %v2538_v48  ;;  %v4784_v53 = vpack.c.bf16 %v2666_v49, %v2666_v49  ;;  %v2536_v54 = vmax.f32 %v1597_v50, 0.0  ;;  %v2664_v55 = vmax.f32 %v2109_v51, 0.0 }
 0x114   : > { %v5047_v56 = vpop.f32.mrf.mxu0  ;;  %v5175_v57 = vpop.f32.mrf.mxu1 }
 0x115   : > { %3819 = vst.msk [vmem:[%s5672_s22 + $0x78] sm:$0xf] %vm3788_vm3, %v4656_v52  ;;  %3947 = vst.msk [vmem:[%s5672_s22 + $0x278] sm:$0xf] %vm3788_vm3, %v4784_v53  ;;  %v4654_v58 = vpack.c.bf16 %v2536_v54, %v2536_v54  ;;  %v4782_v59 = vpack.c.bf16 %v2664_v55, %v2664_v55  ;;  %v2539_v60 = vmax.f32 %v5047_v56, 0.0  ;;  %v2667_v61 = vmax.f32 %v5175_v57, 0.0 }
 0x116   : > { %v1600_v62 = vpop.f32.mrf.mxu0  ;;  %v2112_v63 = vpop.f32.mrf.mxu1 }
 0x117   : > { %3817 = vst.msk [vmem:[%s5672_s22 + $0x70] sm:$0xf] %vm3788_vm3, %v4654_v58  ;;  %3945 = vst.msk [vmem:[%s5672_s22 + $0x270] sm:$0xf] %vm3788_vm3, %v4782_v59  ;;  %v4657_v0 = vpack.c.bf16 %v2539_v60, %v2539_v60  ;;  %v4785_v1 = vpack.c.bf16 %v2667_v61, %v2667_v61  ;;  %v2537_v2 = vmax.f32 %v1600_v62, 0.0  ;;  %v2665_v3 = vmax.f32 %v2112_v63, 0.0 }
 0x118   : > { %v5050_v4 = vpop.f32.mrf.mxu0  ;;  %v5178_v5 = vpop.f32.mrf.mxu1 }
 0x119   : > { %3820 = vst.msk [vmem:[%s5672_s22 + $0x7c] sm:$0xf] %vm3788_vm3, %v4657_v0  ;;  %3948 = vst.msk [vmem:[%s5672_s22 + $0x27c] sm:$0xf] %vm3788_vm3, %v4785_v1  ;;  %v4655_v6 = vpack.c.bf16 %v2537_v2, %v2537_v2  ;;  %v4783_v7 = vpack.c.bf16 %v2665_v3, %v2665_v3  ;;  %v2542_v8 = vmax.f32 %v5050_v4, 0.0  ;;  %v2670_v9 = vmax.f32 %v5178_v5, 0.0 }
 0x11a   : > { %v1613_v10 = vpop.f32.mrf.mxu0  ;;  %v2125_v11 = vpop.f32.mrf.mxu1 }
 0x11b   : > { %3818 = vst.msk [vmem:[%s5672_s22 + $0x74] sm:$0xf] %vm3788_vm3, %v4655_v6  ;;  %3946 = vst.msk [vmem:[%s5672_s22 + $0x274] sm:$0xf] %vm3788_vm3, %v4783_v7  ;;  %v4660_v12 = vpack.c.bf16 %v2542_v8, %v2542_v8  ;;  %v4788_v13 = vpack.c.bf16 %v2670_v9, %v2670_v9  ;;  %v2540_v14 = vmax.f32 %v1613_v10, 0.0  ;;  %v2668_v15 = vmax.f32 %v2125_v11, 0.0 }
 0x11c   : > { %v5051_v16 = vpop.f32.mrf.mxu0  ;;  %v5179_v17 = vpop.f32.mrf.mxu1 }
 0x11d   : > { %3823 = vst.msk [vmem:[%s5672_s22 + $0x88] sm:$0xf] %vm3788_vm3, %v4660_v12  ;;  %3951 = vst.msk [vmem:[%s5672_s22 + $0x288] sm:$0xf] %vm3788_vm3, %v4788_v13  ;;  %v4658_v18 = vpack.c.bf16 %v2540_v14, %v2540_v14  ;;  %v4786_v19 = vpack.c.bf16 %v2668_v15, %v2668_v15  ;;  %v2543_v20 = vmax.f32 %v5051_v16, 0.0  ;;  %v2671_v21 = vmax.f32 %v5179_v17, 0.0 }
 0x11e   : > { %v1616_v22 = vpop.f32.mrf.mxu0  ;;  %v2128_v23 = vpop.f32.mrf.mxu1 }
 0x11f   : > { %3821 = vst.msk [vmem:[%s5672_s22 + $0x80] sm:$0xf] %vm3788_vm3, %v4658_v18  ;;  %3949 = vst.msk [vmem:[%s5672_s22 + $0x280] sm:$0xf] %vm3788_vm3, %v4786_v19  ;;  %v4661_v24 = vpack.c.bf16 %v2543_v20, %v2543_v20  ;;  %v4789_v25 = vpack.c.bf16 %v2671_v21, %v2671_v21  ;;  %v2541_v26 = vmax.f32 %v1616_v22, 0.0  ;;  %v2669_v27 = vmax.f32 %v2128_v23, 0.0 }
 0x120   : > { %v5054_v28 = vpop.f32.mrf.mxu0  ;;  %v5182_v29 = vpop.f32.mrf.mxu1 }
 0x121   : > { %3824 = vst.msk [vmem:[%s5672_s22 + $0x8c] sm:$0xf] %vm3788_vm3, %v4661_v24  ;;  %3952 = vst.msk [vmem:[%s5672_s22 + $0x28c] sm:$0xf] %vm3788_vm3, %v4789_v25  ;;  %v4659_v30 = vpack.c.bf16 %v2541_v26, %v2541_v26  ;;  %v4787_v31 = vpack.c.bf16 %v2669_v27, %v2669_v27  ;;  %v2546_v32 = vmax.f32 %v5054_v28, 0.0  ;;  %v2674_v33 = vmax.f32 %v5182_v29, 0.0 }
 0x122   : > { %v1629_v34 = vpop.f32.mrf.mxu0  ;;  %v2141_v35 = vpop.f32.mrf.mxu1 }
 0x123   : > { %3822 = vst.msk [vmem:[%s5672_s22 + $0x84] sm:$0xf] %vm3788_vm3, %v4659_v30  ;;  %3950 = vst.msk [vmem:[%s5672_s22 + $0x284] sm:$0xf] %vm3788_vm3, %v4787_v31  ;;  %v4664_v36 = vpack.c.bf16 %v2546_v32, %v2546_v32  ;;  %v4792_v37 = vpack.c.bf16 %v2674_v33, %v2674_v33  ;;  %v2544_v38 = vmax.f32 %v1629_v34, 0.0  ;;  %v2672_v39 = vmax.f32 %v2141_v35, 0.0 }
 0x124   : > { %v5055_v40 = vpop.f32.mrf.mxu0  ;;  %v5183_v41 = vpop.f32.mrf.mxu1 }
 0x125   : > { %3827 = vst.msk [vmem:[%s5672_s22 + $0x98] sm:$0xf] %vm3788_vm3, %v4664_v36  ;;  %3955 = vst.msk [vmem:[%s5672_s22 + $0x298] sm:$0xf] %vm3788_vm3, %v4792_v37  ;;  %v4662_v42 = vpack.c.bf16 %v2544_v38, %v2544_v38  ;;  %v4790_v43 = vpack.c.bf16 %v2672_v39, %v2672_v39  ;;  %v2547_v44 = vmax.f32 %v5055_v40, 0.0  ;;  %v2675_v45 = vmax.f32 %v5183_v41, 0.0 }
 0x126   : > { %v1632_v46 = vpop.f32.mrf.mxu0  ;;  %v2144_v47 = vpop.f32.mrf.mxu1 }
 0x127   : > { %3825 = vst.msk [vmem:[%s5672_s22 + $0x90] sm:$0xf] %vm3788_vm3, %v4662_v42  ;;  %3953 = vst.msk [vmem:[%s5672_s22 + $0x290] sm:$0xf] %vm3788_vm3, %v4790_v43  ;;  %v4665_v48 = vpack.c.bf16 %v2547_v44, %v2547_v44  ;;  %v4793_v49 = vpack.c.bf16 %v2675_v45, %v2675_v45  ;;  %v2545_v50 = vmax.f32 %v1632_v46, 0.0  ;;  %v2673_v51 = vmax.f32 %v2144_v47, 0.0 }
 0x128   : > { %v5058_v52 = vpop.f32.mrf.mxu0  ;;  %v5186_v53 = vpop.f32.mrf.mxu1 }
 0x129   : > { %3828 = vst.msk [vmem:[%s5672_s22 + $0x9c] sm:$0xf] %vm3788_vm3, %v4665_v48  ;;  %3956 = vst.msk [vmem:[%s5672_s22 + $0x29c] sm:$0xf] %vm3788_vm3, %v4793_v49  ;;  %v4663_v54 = vpack.c.bf16 %v2545_v50, %v2545_v50  ;;  %v4791_v55 = vpack.c.bf16 %v2673_v51, %v2673_v51  ;;  %v2550_v56 = vmax.f32 %v5058_v52, 0.0  ;;  %v2678_v57 = vmax.f32 %v5186_v53, 0.0 }
 0x12a   : > { %v1645_v58 = vpop.f32.mrf.mxu0  ;;  %v2157_v59 = vpop.f32.mrf.mxu1 }
 0x12b   : > { %3826 = vst.msk [vmem:[%s5672_s22 + $0x94] sm:$0xf] %vm3788_vm3, %v4663_v54  ;;  %3954 = vst.msk [vmem:[%s5672_s22 + $0x294] sm:$0xf] %vm3788_vm3, %v4791_v55  ;;  %v4668_v60 = vpack.c.bf16 %v2550_v56, %v2550_v56  ;;  %v4796_v61 = vpack.c.bf16 %v2678_v57, %v2678_v57  ;;  %v2548_v62 = vmax.f32 %v1645_v58, 0.0  ;;  %v2676_v63 = vmax.f32 %v2157_v59, 0.0 }
 0x12c   : > { %v5059_v0 = vpop.f32.mrf.mxu0  ;;  %v5187_v1 = vpop.f32.mrf.mxu1 }
 0x12d   : > { %3831 = vst.msk [vmem:[%s5672_s22 + $0xa8] sm:$0xf] %vm3788_vm3, %v4668_v60  ;;  %3959 = vst.msk [vmem:[%s5672_s22 + $0x2a8] sm:$0xf] %vm3788_vm3, %v4796_v61  ;;  %v4666_v2 = vpack.c.bf16 %v2548_v62, %v2548_v62  ;;  %v4794_v3 = vpack.c.bf16 %v2676_v63, %v2676_v63  ;;  %v2551_v4 = vmax.f32 %v5059_v0, 0.0  ;;  %v2679_v5 = vmax.f32 %v5187_v1, 0.0 }
 0x12e   : > { %v1648_v6 = vpop.f32.mrf.mxu0  ;;  %v2160_v7 = vpop.f32.mrf.mxu1 }
 0x12f   : > { %3829 = vst.msk [vmem:[%s5672_s22 + $0xa0] sm:$0xf] %vm3788_vm3, %v4666_v2  ;;  %3957 = vst.msk [vmem:[%s5672_s22 + $0x2a0] sm:$0xf] %vm3788_vm3, %v4794_v3  ;;  %v4669_v8 = vpack.c.bf16 %v2551_v4, %v2551_v4  ;;  %v4797_v9 = vpack.c.bf16 %v2679_v5, %v2679_v5  ;;  %v2549_v10 = vmax.f32 %v1648_v6, 0.0  ;;  %v2677_v11 = vmax.f32 %v2160_v7, 0.0 }
 0x130   : > { %v5062_v12 = vpop.f32.mrf.mxu0  ;;  %v5190_v13 = vpop.f32.mrf.mxu1 }
 0x131   : > { %3832 = vst.msk [vmem:[%s5672_s22 + $0xac] sm:$0xf] %vm3788_vm3, %v4669_v8  ;;  %3960 = vst.msk [vmem:[%s5672_s22 + $0x2ac] sm:$0xf] %vm3788_vm3, %v4797_v9  ;;  %v4667_v14 = vpack.c.bf16 %v2549_v10, %v2549_v10  ;;  %v4795_v15 = vpack.c.bf16 %v2677_v11, %v2677_v11  ;;  %v2554_v16 = vmax.f32 %v5062_v12, 0.0  ;;  %v2682_v17 = vmax.f32 %v5190_v13, 0.0 }
 0x132   : > { %v1661_v18 = vpop.f32.mrf.mxu0  ;;  %v2173_v19 = vpop.f32.mrf.mxu1 }
 0x133   : > { %3830 = vst.msk [vmem:[%s5672_s22 + $0xa4] sm:$0xf] %vm3788_vm3, %v4667_v14  ;;  %3958 = vst.msk [vmem:[%s5672_s22 + $0x2a4] sm:$0xf] %vm3788_vm3, %v4795_v15  ;;  %v4672_v20 = vpack.c.bf16 %v2554_v16, %v2554_v16  ;;  %v4800_v21 = vpack.c.bf16 %v2682_v17, %v2682_v17  ;;  %v2552_v22 = vmax.f32 %v1661_v18, 0.0  ;;  %v2680_v23 = vmax.f32 %v2173_v19, 0.0 }
 0x134   : > { %v5063_v24 = vpop.f32.mrf.mxu0  ;;  %v5191_v25 = vpop.f32.mrf.mxu1 }
 0x135   : > { %3835 = vst.msk [vmem:[%s5672_s22 + $0xb8] sm:$0xf] %vm3788_vm3, %v4672_v20  ;;  %3963 = vst.msk [vmem:[%s5672_s22 + $0x2b8] sm:$0xf] %vm3788_vm3, %v4800_v21  ;;  %v4670_v26 = vpack.c.bf16 %v2552_v22, %v2552_v22  ;;  %v4798_v27 = vpack.c.bf16 %v2680_v23, %v2680_v23  ;;  %v2555_v28 = vmax.f32 %v5063_v24, 0.0  ;;  %v2683_v29 = vmax.f32 %v5191_v25, 0.0 }
 0x136   : > { %v1664_v30 = vpop.f32.mrf.mxu0  ;;  %v2176_v31 = vpop.f32.mrf.mxu1 }
 0x137   : > { %3833 = vst.msk [vmem:[%s5672_s22 + $0xb0] sm:$0xf] %vm3788_vm3, %v4670_v26  ;;  %3961 = vst.msk [vmem:[%s5672_s22 + $0x2b0] sm:$0xf] %vm3788_vm3, %v4798_v27  ;;  %v4673_v32 = vpack.c.bf16 %v2555_v28, %v2555_v28  ;;  %v4801_v33 = vpack.c.bf16 %v2683_v29, %v2683_v29  ;;  %v2553_v34 = vmax.f32 %v1664_v30, 0.0  ;;  %v2681_v35 = vmax.f32 %v2176_v31, 0.0 }
 0x138   : > { %v5066_v36 = vpop.f32.mrf.mxu0  ;;  %v5194_v37 = vpop.f32.mrf.mxu1 }
 0x139   : > { %3836 = vst.msk [vmem:[%s5672_s22 + $0xbc] sm:$0xf] %vm3788_vm3, %v4673_v32  ;;  %3964 = vst.msk [vmem:[%s5672_s22 + $0x2bc] sm:$0xf] %vm3788_vm3, %v4801_v33  ;;  %v4671_v38 = vpack.c.bf16 %v2553_v34, %v2553_v34  ;;  %v4799_v39 = vpack.c.bf16 %v2681_v35, %v2681_v35  ;;  %v2558_v40 = vmax.f32 %v5066_v36, 0.0  ;;  %v2686_v41 = vmax.f32 %v5194_v37, 0.0 }
 0x13a   : > { %v1677_v42 = vpop.f32.mrf.mxu0  ;;  %v2189_v43 = vpop.f32.mrf.mxu1 }
 0x13b   : > { %3834 = vst.msk [vmem:[%s5672_s22 + $0xb4] sm:$0xf] %vm3788_vm3, %v4671_v38  ;;  %3962 = vst.msk [vmem:[%s5672_s22 + $0x2b4] sm:$0xf] %vm3788_vm3, %v4799_v39  ;;  %v4676_v44 = vpack.c.bf16 %v2558_v40, %v2558_v40  ;;  %v4804_v45 = vpack.c.bf16 %v2686_v41, %v2686_v41  ;;  %v2556_v46 = vmax.f32 %v1677_v42, 0.0  ;;  %v2684_v47 = vmax.f32 %v2189_v43, 0.0 }
 0x13c   : > { %v5067_v48 = vpop.f32.mrf.mxu0  ;;  %v5195_v49 = vpop.f32.mrf.mxu1 }
 0x13d   : > { %3839 = vst.msk [vmem:[%s5672_s22 + $0xc8] sm:$0xf] %vm3788_vm3, %v4676_v44  ;;  %3967 = vst.msk [vmem:[%s5672_s22 + $0x2c8] sm:$0xf] %vm3788_vm3, %v4804_v45  ;;  %v4674_v50 = vpack.c.bf16 %v2556_v46, %v2556_v46  ;;  %v4802_v51 = vpack.c.bf16 %v2684_v47, %v2684_v47  ;;  %v2559_v52 = vmax.f32 %v5067_v48, 0.0  ;;  %v2687_v53 = vmax.f32 %v5195_v49, 0.0 }
 0x13e   : > { %v1680_v54 = vpop.f32.mrf.mxu0  ;;  %v2192_v55 = vpop.f32.mrf.mxu1 }
 0x13f   : > { %3837 = vst.msk [vmem:[%s5672_s22 + $0xc0] sm:$0xf] %vm3788_vm3, %v4674_v50  ;;  %3965 = vst.msk [vmem:[%s5672_s22 + $0x2c0] sm:$0xf] %vm3788_vm3, %v4802_v51  ;;  %v4677_v56 = vpack.c.bf16 %v2559_v52, %v2559_v52  ;;  %v4805_v57 = vpack.c.bf16 %v2687_v53, %v2687_v53  ;;  %v2557_v58 = vmax.f32 %v1680_v54, 0.0  ;;  %v2685_v59 = vmax.f32 %v2192_v55, 0.0 }
 0x140   : > { %v5070_v60 = vpop.f32.mrf.mxu0  ;;  %v5198_v61 = vpop.f32.mrf.mxu1 }
 0x141   : > { %3840 = vst.msk [vmem:[%s5672_s22 + $0xcc] sm:$0xf] %vm3788_vm3, %v4677_v56  ;;  %3968 = vst.msk [vmem:[%s5672_s22 + $0x2cc] sm:$0xf] %vm3788_vm3, %v4805_v57  ;;  %v4675_v62 = vpack.c.bf16 %v2557_v58, %v2557_v58  ;;  %v4803_v63 = vpack.c.bf16 %v2685_v59, %v2685_v59  ;;  %v2562_v0 = vmax.f32 %v5070_v60, 0.0  ;;  %v2690_v1 = vmax.f32 %v5198_v61, 0.0 }
 0x142   : > { %v1693_v2 = vpop.f32.mrf.mxu0  ;;  %v2205_v3 = vpop.f32.mrf.mxu1 }
 0x143   : > { %3838 = vst.msk [vmem:[%s5672_s22 + $0xc4] sm:$0xf] %vm3788_vm3, %v4675_v62  ;;  %3966 = vst.msk [vmem:[%s5672_s22 + $0x2c4] sm:$0xf] %vm3788_vm3, %v4803_v63  ;;  %v4680_v4 = vpack.c.bf16 %v2562_v0, %v2562_v0  ;;  %v4808_v5 = vpack.c.bf16 %v2690_v1, %v2690_v1  ;;  %v2560_v6 = vmax.f32 %v1693_v2, 0.0  ;;  %v2688_v7 = vmax.f32 %v2205_v3, 0.0 }
 0x144   : > { %v5071_v8 = vpop.f32.mrf.mxu0  ;;  %v5199_v9 = vpop.f32.mrf.mxu1 }
 0x145   : > { %3843 = vst.msk [vmem:[%s5672_s22 + $0xd8] sm:$0xf] %vm3788_vm3, %v4680_v4  ;;  %3971 = vst.msk [vmem:[%s5672_s22 + $0x2d8] sm:$0xf] %vm3788_vm3, %v4808_v5  ;;  %v4678_v10 = vpack.c.bf16 %v2560_v6, %v2560_v6  ;;  %v4806_v11 = vpack.c.bf16 %v2688_v7, %v2688_v7  ;;  %v2563_v12 = vmax.f32 %v5071_v8, 0.0  ;;  %v2691_v13 = vmax.f32 %v5199_v9, 0.0 }
 0x146   : > { %v1696_v14 = vpop.f32.mrf.mxu0  ;;  %v2208_v15 = vpop.f32.mrf.mxu1 }
 0x147   : > { %3841 = vst.msk [vmem:[%s5672_s22 + $0xd0] sm:$0xf] %vm3788_vm3, %v4678_v10  ;;  %3969 = vst.msk [vmem:[%s5672_s22 + $0x2d0] sm:$0xf] %vm3788_vm3, %v4806_v11  ;;  %v4681_v16 = vpack.c.bf16 %v2563_v12, %v2563_v12  ;;  %v4809_v17 = vpack.c.bf16 %v2691_v13, %v2691_v13  ;;  %v2561_v18 = vmax.f32 %v1696_v14, 0.0  ;;  %v2689_v19 = vmax.f32 %v2208_v15, 0.0 }
 0x148   : > { %v5074_v20 = vpop.f32.mrf.mxu0  ;;  %v5202_v21 = vpop.f32.mrf.mxu1 }
 0x149   : > { %3844 = vst.msk [vmem:[%s5672_s22 + $0xdc] sm:$0xf] %vm3788_vm3, %v4681_v16  ;;  %3972 = vst.msk [vmem:[%s5672_s22 + $0x2dc] sm:$0xf] %vm3788_vm3, %v4809_v17  ;;  %v4679_v22 = vpack.c.bf16 %v2561_v18, %v2561_v18  ;;  %v4807_v23 = vpack.c.bf16 %v2689_v19, %v2689_v19  ;;  %v2566_v24 = vmax.f32 %v5074_v20, 0.0  ;;  %v2694_v25 = vmax.f32 %v5202_v21, 0.0 }
 0x14a   : > { %v1709_v26 = vpop.f32.mrf.mxu0  ;;  %v2221_v27 = vpop.f32.mrf.mxu1 }
 0x14b   : > { %3842 = vst.msk [vmem:[%s5672_s22 + $0xd4] sm:$0xf] %vm3788_vm3, %v4679_v22  ;;  %3970 = vst.msk [vmem:[%s5672_s22 + $0x2d4] sm:$0xf] %vm3788_vm3, %v4807_v23  ;;  %v4684_v28 = vpack.c.bf16 %v2566_v24, %v2566_v24  ;;  %v4812_v29 = vpack.c.bf16 %v2694_v25, %v2694_v25  ;;  %v2564_v30 = vmax.f32 %v1709_v26, 0.0  ;;  %v2692_v31 = vmax.f32 %v2221_v27, 0.0 }
 0x14c   : > { %v5075_v32 = vpop.f32.mrf.mxu0  ;;  %v5203_v33 = vpop.f32.mrf.mxu1 }
 0x14d   : > { %3847 = vst.msk [vmem:[%s5672_s22 + $0xe8] sm:$0xf] %vm3788_vm3, %v4684_v28  ;;  %3975 = vst.msk [vmem:[%s5672_s22 + $0x2e8] sm:$0xf] %vm3788_vm3, %v4812_v29  ;;  %v4682_v34 = vpack.c.bf16 %v2564_v30, %v2564_v30  ;;  %v4810_v35 = vpack.c.bf16 %v2692_v31, %v2692_v31  ;;  %v2567_v36 = vmax.f32 %v5075_v32, 0.0  ;;  %v2695_v37 = vmax.f32 %v5203_v33, 0.0 }
 0x14e   : > { %v1712_v38 = vpop.f32.mrf.mxu0  ;;  %v2224_v39 = vpop.f32.mrf.mxu1 }
 0x14f   : > { %3845 = vst.msk [vmem:[%s5672_s22 + $0xe0] sm:$0xf] %vm3788_vm3, %v4682_v34  ;;  %3973 = vst.msk [vmem:[%s5672_s22 + $0x2e0] sm:$0xf] %vm3788_vm3, %v4810_v35  ;;  %v4685_v40 = vpack.c.bf16 %v2567_v36, %v2567_v36  ;;  %v4813_v41 = vpack.c.bf16 %v2695_v37, %v2695_v37  ;;  %v2565_v42 = vmax.f32 %v1712_v38, 0.0  ;;  %v2693_v43 = vmax.f32 %v2224_v39, 0.0 }
 0x150   : > { %v5078_v44 = vpop.f32.mrf.mxu0  ;;  %v5206_v45 = vpop.f32.mrf.mxu1 }
 0x151   : > { %3848 = vst.msk [vmem:[%s5672_s22 + $0xec] sm:$0xf] %vm3788_vm3, %v4685_v40  ;;  %3976 = vst.msk [vmem:[%s5672_s22 + $0x2ec] sm:$0xf] %vm3788_vm3, %v4813_v41  ;;  %v4683_v46 = vpack.c.bf16 %v2565_v42, %v2565_v42  ;;  %v4811_v47 = vpack.c.bf16 %v2693_v43, %v2693_v43  ;;  %v2570_v48 = vmax.f32 %v5078_v44, 0.0  ;;  %v2698_v49 = vmax.f32 %v5206_v45, 0.0 }
 0x152   : > { %v1725_v50 = vpop.f32.mrf.mxu0  ;;  %v2237_v51 = vpop.f32.mrf.mxu1 }
 0x153   : > { %3846 = vst.msk [vmem:[%s5672_s22 + $0xe4] sm:$0xf] %vm3788_vm3, %v4683_v46  ;;  %3974 = vst.msk [vmem:[%s5672_s22 + $0x2e4] sm:$0xf] %vm3788_vm3, %v4811_v47  ;;  %v4688_v52 = vpack.c.bf16 %v2570_v48, %v2570_v48  ;;  %v4816_v53 = vpack.c.bf16 %v2698_v49, %v2698_v49  ;;  %v2568_v54 = vmax.f32 %v1725_v50, 0.0  ;;  %v2696_v55 = vmax.f32 %v2237_v51, 0.0 }
 0x154   : > { %v5079_v56 = vpop.f32.mrf.mxu0  ;;  %v5207_v57 = vpop.f32.mrf.mxu1 }
 0x155   : > { %3851 = vst.msk [vmem:[%s5672_s22 + $0xf8] sm:$0xf] %vm3788_vm3, %v4688_v52  ;;  %3979 = vst.msk [vmem:[%s5672_s22 + $0x2f8] sm:$0xf] %vm3788_vm3, %v4816_v53  ;;  %v4686_v58 = vpack.c.bf16 %v2568_v54, %v2568_v54  ;;  %v4814_v59 = vpack.c.bf16 %v2696_v55, %v2696_v55  ;;  %v2571_v60 = vmax.f32 %v5079_v56, 0.0  ;;  %v2699_v61 = vmax.f32 %v5207_v57, 0.0 }
 0x156   : > { %v1728_v62 = vpop.f32.mrf.mxu0  ;;  %v2240_v63 = vpop.f32.mrf.mxu1 }
 0x157   : > { %3849 = vst.msk [vmem:[%s5672_s22 + $0xf0] sm:$0xf] %vm3788_vm3, %v4686_v58  ;;  %3977 = vst.msk [vmem:[%s5672_s22 + $0x2f0] sm:$0xf] %vm3788_vm3, %v4814_v59  ;;  %v4689_v0 = vpack.c.bf16 %v2571_v60, %v2571_v60  ;;  %v4817_v1 = vpack.c.bf16 %v2699_v61, %v2699_v61  ;;  %v2569_v2 = vmax.f32 %v1728_v62, 0.0  ;;  %v2697_v3 = vmax.f32 %v2240_v63, 0.0 }
 0x158   : > { %v5082_v4 = vpop.f32.mrf.mxu0  ;;  %v5210_v5 = vpop.f32.mrf.mxu1 }
 0x159   : > { %3852 = vst.msk [vmem:[%s5672_s22 + $0xfc] sm:$0xf] %vm3788_vm3, %v4689_v0  ;;  %3980 = vst.msk [vmem:[%s5672_s22 + $0x2fc] sm:$0xf] %vm3788_vm3, %v4817_v1  ;;  %v4687_v6 = vpack.c.bf16 %v2569_v2, %v2569_v2  ;;  %v4815_v7 = vpack.c.bf16 %v2697_v3, %v2697_v3  ;;  %v2574_v8 = vmax.f32 %v5082_v4, 0.0  ;;  %v2702_v9 = vmax.f32 %v5210_v5, 0.0 }
 0x15a   : > { %v1741_v10 = vpop.f32.mrf.mxu0  ;;  %v2253_v11 = vpop.f32.mrf.mxu1 }
 0x15b   : > { %3850 = vst.msk [vmem:[%s5672_s22 + $0xf4] sm:$0xf] %vm3788_vm3, %v4687_v6  ;;  %3978 = vst.msk [vmem:[%s5672_s22 + $0x2f4] sm:$0xf] %vm3788_vm3, %v4815_v7  ;;  %v4692_v12 = vpack.c.bf16 %v2574_v8, %v2574_v8  ;;  %v4820_v13 = vpack.c.bf16 %v2702_v9, %v2702_v9  ;;  %v2572_v14 = vmax.f32 %v1741_v10, 0.0  ;;  %v2700_v15 = vmax.f32 %v2253_v11, 0.0 }
 0x15c   : > { %v5083_v16 = vpop.f32.mrf.mxu0  ;;  %v5211_v17 = vpop.f32.mrf.mxu1 }
 0x15d   : > { %3855 = vst.msk [vmem:[%s5672_s22 + $0x108] sm:$0xf] %vm3788_vm3, %v4692_v12  ;;  %3983 = vst.msk [vmem:[%s5672_s22 + $0x308] sm:$0xf] %vm3788_vm3, %v4820_v13  ;;  %v4690_v18 = vpack.c.bf16 %v2572_v14, %v2572_v14  ;;  %v4818_v19 = vpack.c.bf16 %v2700_v15, %v2700_v15  ;;  %v2575_v20 = vmax.f32 %v5083_v16, 0.0  ;;  %v2703_v21 = vmax.f32 %v5211_v17, 0.0 }
 0x15e   : > { %v1744_v22 = vpop.f32.mrf.mxu0  ;;  %v2256_v23 = vpop.f32.mrf.mxu1 }
 0x15f   : > { %3853 = vst.msk [vmem:[%s5672_s22 + $0x100] sm:$0xf] %vm3788_vm3, %v4690_v18  ;;  %3981 = vst.msk [vmem:[%s5672_s22 + $0x300] sm:$0xf] %vm3788_vm3, %v4818_v19  ;;  %v4693_v24 = vpack.c.bf16 %v2575_v20, %v2575_v20  ;;  %v4821_v25 = vpack.c.bf16 %v2703_v21, %v2703_v21  ;;  %v2573_v26 = vmax.f32 %v1744_v22, 0.0  ;;  %v2701_v27 = vmax.f32 %v2256_v23, 0.0 }
 0x160   : > { %v5086_v28 = vpop.f32.mrf.mxu0  ;;  %v5214_v29 = vpop.f32.mrf.mxu1 }
 0x161   : > { %3856 = vst.msk [vmem:[%s5672_s22 + $0x10c] sm:$0xf] %vm3788_vm3, %v4693_v24  ;;  %3984 = vst.msk [vmem:[%s5672_s22 + $0x30c] sm:$0xf] %vm3788_vm3, %v4821_v25  ;;  %v4691_v30 = vpack.c.bf16 %v2573_v26, %v2573_v26  ;;  %v4819_v31 = vpack.c.bf16 %v2701_v27, %v2701_v27  ;;  %v2578_v32 = vmax.f32 %v5086_v28, 0.0  ;;  %v2706_v33 = vmax.f32 %v5214_v29, 0.0 }
 0x162   : > { %v1757_v34 = vpop.f32.mrf.mxu0  ;;  %v2269_v35 = vpop.f32.mrf.mxu1 }
 0x163   : > { %3854 = vst.msk [vmem:[%s5672_s22 + $0x104] sm:$0xf] %vm3788_vm3, %v4691_v30  ;;  %3982 = vst.msk [vmem:[%s5672_s22 + $0x304] sm:$0xf] %vm3788_vm3, %v4819_v31  ;;  %v4696_v36 = vpack.c.bf16 %v2578_v32, %v2578_v32  ;;  %v4824_v37 = vpack.c.bf16 %v2706_v33, %v2706_v33  ;;  %v2576_v38 = vmax.f32 %v1757_v34, 0.0  ;;  %v2704_v39 = vmax.f32 %v2269_v35, 0.0 }
 0x164   : > { %v5087_v40 = vpop.f32.mrf.mxu0  ;;  %v5215_v41 = vpop.f32.mrf.mxu1 }
 0x165   : > { %3859 = vst.msk [vmem:[%s5672_s22 + $0x118] sm:$0xf] %vm3788_vm3, %v4696_v36  ;;  %3987 = vst.msk [vmem:[%s5672_s22 + $0x318] sm:$0xf] %vm3788_vm3, %v4824_v37  ;;  %v4694_v42 = vpack.c.bf16 %v2576_v38, %v2576_v38  ;;  %v4822_v43 = vpack.c.bf16 %v2704_v39, %v2704_v39  ;;  %v2579_v44 = vmax.f32 %v5087_v40, 0.0  ;;  %v2707_v45 = vmax.f32 %v5215_v41, 0.0 }
 0x166   : > { %v1760_v46 = vpop.f32.mrf.mxu0  ;;  %v2272_v47 = vpop.f32.mrf.mxu1 }
 0x167   : > { %3857 = vst.msk [vmem:[%s5672_s22 + $0x110] sm:$0xf] %vm3788_vm3, %v4694_v42  ;;  %3985 = vst.msk [vmem:[%s5672_s22 + $0x310] sm:$0xf] %vm3788_vm3, %v4822_v43  ;;  %v4697_v48 = vpack.c.bf16 %v2579_v44, %v2579_v44  ;;  %v4825_v49 = vpack.c.bf16 %v2707_v45, %v2707_v45  ;;  %v2577_v50 = vmax.f32 %v1760_v46, 0.0  ;;  %v2705_v51 = vmax.f32 %v2272_v47, 0.0 }
 0x168   : > { %v5090_v52 = vpop.f32.mrf.mxu0  ;;  %v5218_v53 = vpop.f32.mrf.mxu1 }
 0x169   : > { %3860 = vst.msk [vmem:[%s5672_s22 + $0x11c] sm:$0xf] %vm3788_vm3, %v4697_v48  ;;  %3988 = vst.msk [vmem:[%s5672_s22 + $0x31c] sm:$0xf] %vm3788_vm3, %v4825_v49  ;;  %v4695_v54 = vpack.c.bf16 %v2577_v50, %v2577_v50  ;;  %v4823_v55 = vpack.c.bf16 %v2705_v51, %v2705_v51  ;;  %v2582_v56 = vmax.f32 %v5090_v52, 0.0  ;;  %v2710_v57 = vmax.f32 %v5218_v53, 0.0 }
 0x16a   : > { %v1773_v58 = vpop.f32.mrf.mxu0  ;;  %v2285_v59 = vpop.f32.mrf.mxu1 }
 0x16b   : > { %3858 = vst.msk [vmem:[%s5672_s22 + $0x114] sm:$0xf] %vm3788_vm3, %v4695_v54  ;;  %3986 = vst.msk [vmem:[%s5672_s22 + $0x314] sm:$0xf] %vm3788_vm3, %v4823_v55  ;;  %v4700_v60 = vpack.c.bf16 %v2582_v56, %v2582_v56  ;;  %v4828_v61 = vpack.c.bf16 %v2710_v57, %v2710_v57  ;;  %v2580_v62 = vmax.f32 %v1773_v58, 0.0  ;;  %v2708_v63 = vmax.f32 %v2285_v59, 0.0 }
 0x16c   : > { %v5091_v0 = vpop.f32.mrf.mxu0  ;;  %v5219_v1 = vpop.f32.mrf.mxu1 }
 0x16d   : > { %3863 = vst.msk [vmem:[%s5672_s22 + $0x128] sm:$0xf] %vm3788_vm3, %v4700_v60  ;;  %3991 = vst.msk [vmem:[%s5672_s22 + $0x328] sm:$0xf] %vm3788_vm3, %v4828_v61  ;;  %v4698_v2 = vpack.c.bf16 %v2580_v62, %v2580_v62  ;;  %v4826_v3 = vpack.c.bf16 %v2708_v63, %v2708_v63  ;;  %v2583_v4 = vmax.f32 %v5091_v0, 0.0  ;;  %v2711_v5 = vmax.f32 %v5219_v1, 0.0 }
 0x16e   : > { %v1776_v6 = vpop.f32.mrf.mxu0  ;;  %v2288_v7 = vpop.f32.mrf.mxu1 }
 0x16f   : > { %3861 = vst.msk [vmem:[%s5672_s22 + $0x120] sm:$0xf] %vm3788_vm3, %v4698_v2  ;;  %3989 = vst.msk [vmem:[%s5672_s22 + $0x320] sm:$0xf] %vm3788_vm3, %v4826_v3  ;;  %v4701_v8 = vpack.c.bf16 %v2583_v4, %v2583_v4  ;;  %v4829_v9 = vpack.c.bf16 %v2711_v5, %v2711_v5  ;;  %v2581_v10 = vmax.f32 %v1776_v6, 0.0  ;;  %v2709_v11 = vmax.f32 %v2288_v7, 0.0 }
 0x170   : > { %v5094_v12 = vpop.f32.mrf.mxu0  ;;  %v5222_v13 = vpop.f32.mrf.mxu1 }
 0x171   : > { %3864 = vst.msk [vmem:[%s5672_s22 + $0x12c] sm:$0xf] %vm3788_vm3, %v4701_v8  ;;  %3992 = vst.msk [vmem:[%s5672_s22 + $0x32c] sm:$0xf] %vm3788_vm3, %v4829_v9  ;;  %v4699_v14 = vpack.c.bf16 %v2581_v10, %v2581_v10  ;;  %v4827_v15 = vpack.c.bf16 %v2709_v11, %v2709_v11  ;;  %v2586_v16 = vmax.f32 %v5094_v12, 0.0  ;;  %v2714_v17 = vmax.f32 %v5222_v13, 0.0 }
 0x172   : > { %v1789_v18 = vpop.f32.mrf.mxu0  ;;  %v2301_v19 = vpop.f32.mrf.mxu1 }
 0x173   : > { %3862 = vst.msk [vmem:[%s5672_s22 + $0x124] sm:$0xf] %vm3788_vm3, %v4699_v14  ;;  %3990 = vst.msk [vmem:[%s5672_s22 + $0x324] sm:$0xf] %vm3788_vm3, %v4827_v15  ;;  %v4704_v20 = vpack.c.bf16 %v2586_v16, %v2586_v16  ;;  %v4832_v21 = vpack.c.bf16 %v2714_v17, %v2714_v17  ;;  %v2584_v22 = vmax.f32 %v1789_v18, 0.0  ;;  %v2712_v23 = vmax.f32 %v2301_v19, 0.0 }
 0x174   : > { %v5095_v24 = vpop.f32.mrf.mxu0  ;;  %v5223_v25 = vpop.f32.mrf.mxu1 }
 0x175   : > { %3867 = vst.msk [vmem:[%s5672_s22 + $0x138] sm:$0xf] %vm3788_vm3, %v4704_v20  ;;  %3995 = vst.msk [vmem:[%s5672_s22 + $0x338] sm:$0xf] %vm3788_vm3, %v4832_v21  ;;  %v4702_v26 = vpack.c.bf16 %v2584_v22, %v2584_v22  ;;  %v4830_v27 = vpack.c.bf16 %v2712_v23, %v2712_v23  ;;  %v2587_v28 = vmax.f32 %v5095_v24, 0.0  ;;  %v2715_v29 = vmax.f32 %v5223_v25, 0.0 }
 0x176   : > { %v1792_v30 = vpop.f32.mrf.mxu0  ;;  %v2304_v31 = vpop.f32.mrf.mxu1 }
 0x177   : > { %3865 = vst.msk [vmem:[%s5672_s22 + $0x130] sm:$0xf] %vm3788_vm3, %v4702_v26  ;;  %3993 = vst.msk [vmem:[%s5672_s22 + $0x330] sm:$0xf] %vm3788_vm3, %v4830_v27  ;;  %v4705_v32 = vpack.c.bf16 %v2587_v28, %v2587_v28  ;;  %v4833_v33 = vpack.c.bf16 %v2715_v29, %v2715_v29  ;;  %v2585_v34 = vmax.f32 %v1792_v30, 0.0  ;;  %v2713_v35 = vmax.f32 %v2304_v31, 0.0 }
 0x178   : > { %v5098_v36 = vpop.f32.mrf.mxu0  ;;  %v5226_v37 = vpop.f32.mrf.mxu1 }
 0x179   : > { %3868 = vst.msk [vmem:[%s5672_s22 + $0x13c] sm:$0xf] %vm3788_vm3, %v4705_v32  ;;  %3996 = vst.msk [vmem:[%s5672_s22 + $0x33c] sm:$0xf] %vm3788_vm3, %v4833_v33  ;;  %v4703_v38 = vpack.c.bf16 %v2585_v34, %v2585_v34  ;;  %v4831_v39 = vpack.c.bf16 %v2713_v35, %v2713_v35  ;;  %v2590_v40 = vmax.f32 %v5098_v36, 0.0  ;;  %v2718_v41 = vmax.f32 %v5226_v37, 0.0 }
 0x17a   : > { %v1805_v42 = vpop.f32.mrf.mxu0  ;;  %v2317_v43 = vpop.f32.mrf.mxu1 }
 0x17b   : > { %3866 = vst.msk [vmem:[%s5672_s22 + $0x134] sm:$0xf] %vm3788_vm3, %v4703_v38  ;;  %3994 = vst.msk [vmem:[%s5672_s22 + $0x334] sm:$0xf] %vm3788_vm3, %v4831_v39  ;;  %v4708_v44 = vpack.c.bf16 %v2590_v40, %v2590_v40  ;;  %v4836_v45 = vpack.c.bf16 %v2718_v41, %v2718_v41  ;;  %v2588_v46 = vmax.f32 %v1805_v42, 0.0  ;;  %v2716_v47 = vmax.f32 %v2317_v43, 0.0 }
 0x17c   : > { %v5099_v48 = vpop.f32.mrf.mxu0  ;;  %v5227_v49 = vpop.f32.mrf.mxu1 }
 0x17d   : > { %3871 = vst.msk [vmem:[%s5672_s22 + $0x148] sm:$0xf] %vm3788_vm3, %v4708_v44  ;;  %3999 = vst.msk [vmem:[%s5672_s22 + $0x348] sm:$0xf] %vm3788_vm3, %v4836_v45  ;;  %v4706_v50 = vpack.c.bf16 %v2588_v46, %v2588_v46  ;;  %v4834_v51 = vpack.c.bf16 %v2716_v47, %v2716_v47  ;;  %v2591_v52 = vmax.f32 %v5099_v48, 0.0  ;;  %v2719_v53 = vmax.f32 %v5227_v49, 0.0 }
 0x17e   : > { %v1808_v54 = vpop.f32.mrf.mxu0  ;;  %v2320_v55 = vpop.f32.mrf.mxu1 }
 0x17f   : > { %3869 = vst.msk [vmem:[%s5672_s22 + $0x140] sm:$0xf] %vm3788_vm3, %v4706_v50  ;;  %3997 = vst.msk [vmem:[%s5672_s22 + $0x340] sm:$0xf] %vm3788_vm3, %v4834_v51  ;;  %v4709_v56 = vpack.c.bf16 %v2591_v52, %v2591_v52  ;;  %v4837_v57 = vpack.c.bf16 %v2719_v53, %v2719_v53  ;;  %v2589_v58 = vmax.f32 %v1808_v54, 0.0  ;;  %v2717_v59 = vmax.f32 %v2320_v55, 0.0 }
 0x180   : > { %v5102_v60 = vpop.f32.mrf.mxu0  ;;  %v5230_v61 = vpop.f32.mrf.mxu1 }
 0x181   : > { %3872 = vst.msk [vmem:[%s5672_s22 + $0x14c] sm:$0xf] %vm3788_vm3, %v4709_v56  ;;  %4000 = vst.msk [vmem:[%s5672_s22 + $0x34c] sm:$0xf] %vm3788_vm3, %v4837_v57  ;;  %v4707_v62 = vpack.c.bf16 %v2589_v58, %v2589_v58  ;;  %v4835_v63 = vpack.c.bf16 %v2717_v59, %v2717_v59  ;;  %v2594_v0 = vmax.f32 %v5102_v60, 0.0  ;;  %v2722_v1 = vmax.f32 %v5230_v61, 0.0 }
 0x182   : > { %v1821_v2 = vpop.f32.mrf.mxu0  ;;  %v2333_v3 = vpop.f32.mrf.mxu1 }
 0x183   : > { %3870 = vst.msk [vmem:[%s5672_s22 + $0x144] sm:$0xf] %vm3788_vm3, %v4707_v62  ;;  %3998 = vst.msk [vmem:[%s5672_s22 + $0x344] sm:$0xf] %vm3788_vm3, %v4835_v63  ;;  %v4712_v4 = vpack.c.bf16 %v2594_v0, %v2594_v0  ;;  %v4840_v5 = vpack.c.bf16 %v2722_v1, %v2722_v1  ;;  %v2592_v6 = vmax.f32 %v1821_v2, 0.0  ;;  %v2720_v7 = vmax.f32 %v2333_v3, 0.0 }
 0x184   : > { %v5103_v8 = vpop.f32.mrf.mxu0  ;;  %v5231_v9 = vpop.f32.mrf.mxu1 }
 0x185   : > { %3875 = vst.msk [vmem:[%s5672_s22 + $0x158] sm:$0xf] %vm3788_vm3, %v4712_v4  ;;  %4003 = vst.msk [vmem:[%s5672_s22 + $0x358] sm:$0xf] %vm3788_vm3, %v4840_v5  ;;  %v4710_v10 = vpack.c.bf16 %v2592_v6, %v2592_v6  ;;  %v4838_v11 = vpack.c.bf16 %v2720_v7, %v2720_v7  ;;  %v2595_v12 = vmax.f32 %v5103_v8, 0.0  ;;  %v2723_v13 = vmax.f32 %v5231_v9, 0.0 }
 0x186   : > { %v1824_v14 = vpop.f32.mrf.mxu0  ;;  %v2336_v15 = vpop.f32.mrf.mxu1 }
 0x187   : > { %3873 = vst.msk [vmem:[%s5672_s22 + $0x150] sm:$0xf] %vm3788_vm3, %v4710_v10  ;;  %4001 = vst.msk [vmem:[%s5672_s22 + $0x350] sm:$0xf] %vm3788_vm3, %v4838_v11  ;;  %v4713_v16 = vpack.c.bf16 %v2595_v12, %v2595_v12  ;;  %v4841_v17 = vpack.c.bf16 %v2723_v13, %v2723_v13  ;;  %v2593_v18 = vmax.f32 %v1824_v14, 0.0  ;;  %v2721_v19 = vmax.f32 %v2336_v15, 0.0 }
 0x188   : > { %v5106_v20 = vpop.f32.mrf.mxu0  ;;  %v5234_v21 = vpop.f32.mrf.mxu1 }
 0x189   : > { %3876 = vst.msk [vmem:[%s5672_s22 + $0x15c] sm:$0xf] %vm3788_vm3, %v4713_v16  ;;  %4004 = vst.msk [vmem:[%s5672_s22 + $0x35c] sm:$0xf] %vm3788_vm3, %v4841_v17  ;;  %v4711_v22 = vpack.c.bf16 %v2593_v18, %v2593_v18  ;;  %v4839_v23 = vpack.c.bf16 %v2721_v19, %v2721_v19  ;;  %v2598_v24 = vmax.f32 %v5106_v20, 0.0  ;;  %v2726_v25 = vmax.f32 %v5234_v21, 0.0 }
 0x18a   : > { %v1837_v26 = vpop.f32.mrf.mxu0  ;;  %v2349_v27 = vpop.f32.mrf.mxu1 }
 0x18b   : > { %3874 = vst.msk [vmem:[%s5672_s22 + $0x154] sm:$0xf] %vm3788_vm3, %v4711_v22  ;;  %4002 = vst.msk [vmem:[%s5672_s22 + $0x354] sm:$0xf] %vm3788_vm3, %v4839_v23  ;;  %v4716_v28 = vpack.c.bf16 %v2598_v24, %v2598_v24  ;;  %v4844_v29 = vpack.c.bf16 %v2726_v25, %v2726_v25  ;;  %v2596_v30 = vmax.f32 %v1837_v26, 0.0  ;;  %v2724_v31 = vmax.f32 %v2349_v27, 0.0 }
 0x18c   : > { %v5107_v32 = vpop.f32.mrf.mxu0  ;;  %v5235_v33 = vpop.f32.mrf.mxu1 }
 0x18d   : > { %3879 = vst.msk [vmem:[%s5672_s22 + $0x168] sm:$0xf] %vm3788_vm3, %v4716_v28  ;;  %4007 = vst.msk [vmem:[%s5672_s22 + $0x368] sm:$0xf] %vm3788_vm3, %v4844_v29  ;;  %v4714_v34 = vpack.c.bf16 %v2596_v30, %v2596_v30  ;;  %v4842_v35 = vpack.c.bf16 %v2724_v31, %v2724_v31  ;;  %v2599_v36 = vmax.f32 %v5107_v32, 0.0  ;;  %v2727_v37 = vmax.f32 %v5235_v33, 0.0 }
 0x18e   : > { %v1840_v38 = vpop.f32.mrf.mxu0  ;;  %v2352_v39 = vpop.f32.mrf.mxu1 }
 0x18f   : > { %3877 = vst.msk [vmem:[%s5672_s22 + $0x160] sm:$0xf] %vm3788_vm3, %v4714_v34  ;;  %4005 = vst.msk [vmem:[%s5672_s22 + $0x360] sm:$0xf] %vm3788_vm3, %v4842_v35  ;;  %v4717_v40 = vpack.c.bf16 %v2599_v36, %v2599_v36  ;;  %v4845_v41 = vpack.c.bf16 %v2727_v37, %v2727_v37  ;;  %v2597_v42 = vmax.f32 %v1840_v38, 0.0  ;;  %v2725_v43 = vmax.f32 %v2352_v39, 0.0 }
 0x190   : > { %v5110_v44 = vpop.f32.mrf.mxu0  ;;  %v5238_v45 = vpop.f32.mrf.mxu1 }
 0x191   : > { %3880 = vst.msk [vmem:[%s5672_s22 + $0x16c] sm:$0xf] %vm3788_vm3, %v4717_v40  ;;  %4008 = vst.msk [vmem:[%s5672_s22 + $0x36c] sm:$0xf] %vm3788_vm3, %v4845_v41  ;;  %v4715_v46 = vpack.c.bf16 %v2597_v42, %v2597_v42  ;;  %v4843_v47 = vpack.c.bf16 %v2725_v43, %v2725_v43  ;;  %v2602_v48 = vmax.f32 %v5110_v44, 0.0  ;;  %v2730_v49 = vmax.f32 %v5238_v45, 0.0 }
 0x192   : > { %v1853_v50 = vpop.f32.mrf.mxu0  ;;  %v2365_v51 = vpop.f32.mrf.mxu1 }
 0x193   : > { %3878 = vst.msk [vmem:[%s5672_s22 + $0x164] sm:$0xf] %vm3788_vm3, %v4715_v46  ;;  %4006 = vst.msk [vmem:[%s5672_s22 + $0x364] sm:$0xf] %vm3788_vm3, %v4843_v47  ;;  %v4720_v52 = vpack.c.bf16 %v2602_v48, %v2602_v48  ;;  %v4848_v53 = vpack.c.bf16 %v2730_v49, %v2730_v49  ;;  %v2600_v54 = vmax.f32 %v1853_v50, 0.0  ;;  %v2728_v55 = vmax.f32 %v2365_v51, 0.0 }
 0x194   : > { %v5111_v56 = vpop.f32.mrf.mxu0  ;;  %v5239_v57 = vpop.f32.mrf.mxu1 }
 0x195   : > { %3883 = vst.msk [vmem:[%s5672_s22 + $0x178] sm:$0xf] %vm3788_vm3, %v4720_v52  ;;  %4011 = vst.msk [vmem:[%s5672_s22 + $0x378] sm:$0xf] %vm3788_vm3, %v4848_v53  ;;  %v4718_v58 = vpack.c.bf16 %v2600_v54, %v2600_v54  ;;  %v4846_v59 = vpack.c.bf16 %v2728_v55, %v2728_v55  ;;  %v2603_v60 = vmax.f32 %v5111_v56, 0.0  ;;  %v2731_v61 = vmax.f32 %v5239_v57, 0.0 }
 0x196   : > { %v1856_v62 = vpop.f32.mrf.mxu0  ;;  %v2368_v63 = vpop.f32.mrf.mxu1 }
 0x197   : > { %3881 = vst.msk [vmem:[%s5672_s22 + $0x170] sm:$0xf] %vm3788_vm3, %v4718_v58  ;;  %4009 = vst.msk [vmem:[%s5672_s22 + $0x370] sm:$0xf] %vm3788_vm3, %v4846_v59  ;;  %v4721_v0 = vpack.c.bf16 %v2603_v60, %v2603_v60  ;;  %v4849_v1 = vpack.c.bf16 %v2731_v61, %v2731_v61  ;;  %v2601_v2 = vmax.f32 %v1856_v62, 0.0  ;;  %v2729_v3 = vmax.f32 %v2368_v63, 0.0 }
 0x198   : > { %v5114_v4 = vpop.f32.mrf.mxu0  ;;  %v5242_v5 = vpop.f32.mrf.mxu1 }
 0x199   : > { %3884 = vst.msk [vmem:[%s5672_s22 + $0x17c] sm:$0xf] %vm3788_vm3, %v4721_v0  ;;  %4012 = vst.msk [vmem:[%s5672_s22 + $0x37c] sm:$0xf] %vm3788_vm3, %v4849_v1  ;;  %v4719_v6 = vpack.c.bf16 %v2601_v2, %v2601_v2  ;;  %v4847_v7 = vpack.c.bf16 %v2729_v3, %v2729_v3  ;;  %v2606_v8 = vmax.f32 %v5114_v4, 0.0  ;;  %v2734_v9 = vmax.f32 %v5242_v5, 0.0 }
 0x19a   : > { %v1869_v10 = vpop.f32.mrf.mxu0  ;;  %v2381_v11 = vpop.f32.mrf.mxu1 }
 0x19b   : > { %3882 = vst.msk [vmem:[%s5672_s22 + $0x174] sm:$0xf] %vm3788_vm3, %v4719_v6  ;;  %4010 = vst.msk [vmem:[%s5672_s22 + $0x374] sm:$0xf] %vm3788_vm3, %v4847_v7  ;;  %v4724_v12 = vpack.c.bf16 %v2606_v8, %v2606_v8  ;;  %v4852_v13 = vpack.c.bf16 %v2734_v9, %v2734_v9  ;;  %v2604_v14 = vmax.f32 %v1869_v10, 0.0  ;;  %v2732_v15 = vmax.f32 %v2381_v11, 0.0 }
 0x19c   : > { %v5115_v16 = vpop.f32.mrf.mxu0  ;;  %v5243_v17 = vpop.f32.mrf.mxu1 }
 0x19d   : > { %3887 = vst.msk [vmem:[%s5672_s22 + $0x188] sm:$0xf] %vm3788_vm3, %v4724_v12  ;;  %4015 = vst.msk [vmem:[%s5672_s22 + $0x388] sm:$0xf] %vm3788_vm3, %v4852_v13  ;;  %v4722_v18 = vpack.c.bf16 %v2604_v14, %v2604_v14  ;;  %v4850_v19 = vpack.c.bf16 %v2732_v15, %v2732_v15  ;;  %v2607_v20 = vmax.f32 %v5115_v16, 0.0  ;;  %v2735_v21 = vmax.f32 %v5243_v17, 0.0 }
 0x19e   : > { %v1872_v22 = vpop.f32.mrf.mxu0  ;;  %v2384_v23 = vpop.f32.mrf.mxu1 }
 0x19f   : > { %3885 = vst.msk [vmem:[%s5672_s22 + $0x180] sm:$0xf] %vm3788_vm3, %v4722_v18  ;;  %4013 = vst.msk [vmem:[%s5672_s22 + $0x380] sm:$0xf] %vm3788_vm3, %v4850_v19  ;;  %v4725_v24 = vpack.c.bf16 %v2607_v20, %v2607_v20  ;;  %v4853_v25 = vpack.c.bf16 %v2735_v21, %v2735_v21  ;;  %v2605_v26 = vmax.f32 %v1872_v22, 0.0  ;;  %v2733_v27 = vmax.f32 %v2384_v23, 0.0 }
 0x1a0   : > { %v5118_v28 = vpop.f32.mrf.mxu0  ;;  %v5246_v29 = vpop.f32.mrf.mxu1 }
 0x1a1   : > { %3888 = vst.msk [vmem:[%s5672_s22 + $0x18c] sm:$0xf] %vm3788_vm3, %v4725_v24  ;;  %4016 = vst.msk [vmem:[%s5672_s22 + $0x38c] sm:$0xf] %vm3788_vm3, %v4853_v25  ;;  %v4723_v30 = vpack.c.bf16 %v2605_v26, %v2605_v26  ;;  %v4851_v31 = vpack.c.bf16 %v2733_v27, %v2733_v27  ;;  %v2610_v32 = vmax.f32 %v5118_v28, 0.0  ;;  %v2738_v33 = vmax.f32 %v5246_v29, 0.0 }
 0x1a2   : > { %v1885_v34 = vpop.f32.mrf.mxu0  ;;  %v2397_v35 = vpop.f32.mrf.mxu1 }
 0x1a3   : > { %3886 = vst.msk [vmem:[%s5672_s22 + $0x184] sm:$0xf] %vm3788_vm3, %v4723_v30  ;;  %4014 = vst.msk [vmem:[%s5672_s22 + $0x384] sm:$0xf] %vm3788_vm3, %v4851_v31  ;;  %v4728_v36 = vpack.c.bf16 %v2610_v32, %v2610_v32  ;;  %v4856_v37 = vpack.c.bf16 %v2738_v33, %v2738_v33  ;;  %v2608_v38 = vmax.f32 %v1885_v34, 0.0  ;;  %v2736_v39 = vmax.f32 %v2397_v35, 0.0 }
 0x1a4   : > { %v5119_v40 = vpop.f32.mrf.mxu0  ;;  %v5247_v41 = vpop.f32.mrf.mxu1 }
 0x1a5   : > { %3891 = vst.msk [vmem:[%s5672_s22 + $0x198] sm:$0xf] %vm3788_vm3, %v4728_v36  ;;  %4019 = vst.msk [vmem:[%s5672_s22 + $0x398] sm:$0xf] %vm3788_vm3, %v4856_v37  ;;  %v4726_v42 = vpack.c.bf16 %v2608_v38, %v2608_v38  ;;  %v4854_v43 = vpack.c.bf16 %v2736_v39, %v2736_v39  ;;  %v2611_v44 = vmax.f32 %v5119_v40, 0.0  ;;  %v2739_v45 = vmax.f32 %v5247_v41, 0.0 }
 0x1a6   : > { %v1888_v46 = vpop.f32.mrf.mxu0  ;;  %v2400_v47 = vpop.f32.mrf.mxu1 }
 0x1a7   : > { %3889 = vst.msk [vmem:[%s5672_s22 + $0x190] sm:$0xf] %vm3788_vm3, %v4726_v42  ;;  %4017 = vst.msk [vmem:[%s5672_s22 + $0x390] sm:$0xf] %vm3788_vm3, %v4854_v43  ;;  %v4729_v48 = vpack.c.bf16 %v2611_v44, %v2611_v44  ;;  %v4857_v49 = vpack.c.bf16 %v2739_v45, %v2739_v45  ;;  %v2609_v50 = vmax.f32 %v1888_v46, 0.0  ;;  %v2737_v51 = vmax.f32 %v2400_v47, 0.0 }
 0x1a8   : > { %v5122_v52 = vpop.f32.mrf.mxu0  ;;  %v5250_v53 = vpop.f32.mrf.mxu1 }
 0x1a9   : > { %3892 = vst.msk [vmem:[%s5672_s22 + $0x19c] sm:$0xf] %vm3788_vm3, %v4729_v48  ;;  %4020 = vst.msk [vmem:[%s5672_s22 + $0x39c] sm:$0xf] %vm3788_vm3, %v4857_v49  ;;  %v4727_v54 = vpack.c.bf16 %v2609_v50, %v2609_v50  ;;  %v4855_v55 = vpack.c.bf16 %v2737_v51, %v2737_v51  ;;  %v2614_v56 = vmax.f32 %v5122_v52, 0.0  ;;  %v2742_v57 = vmax.f32 %v5250_v53, 0.0 }
 0x1aa   : > { %v1901_v58 = vpop.f32.mrf.mxu0  ;;  %v2413_v59 = vpop.f32.mrf.mxu1 }
 0x1ab   : > { %3890 = vst.msk [vmem:[%s5672_s22 + $0x194] sm:$0xf] %vm3788_vm3, %v4727_v54  ;;  %4018 = vst.msk [vmem:[%s5672_s22 + $0x394] sm:$0xf] %vm3788_vm3, %v4855_v55  ;;  %v4732_v60 = vpack.c.bf16 %v2614_v56, %v2614_v56  ;;  %v4860_v61 = vpack.c.bf16 %v2742_v57, %v2742_v57  ;;  %v2612_v62 = vmax.f32 %v1901_v58, 0.0  ;;  %v2740_v63 = vmax.f32 %v2413_v59, 0.0 }
 0x1ac   : > { %v5123_v0 = vpop.f32.mrf.mxu0  ;;  %v5251_v1 = vpop.f32.mrf.mxu1 }
 0x1ad   : > { %3895 = vst.msk [vmem:[%s5672_s22 + $0x1a8] sm:$0xf] %vm3788_vm3, %v4732_v60  ;;  %4023 = vst.msk [vmem:[%s5672_s22 + $0x3a8] sm:$0xf] %vm3788_vm3, %v4860_v61  ;;  %v4730_v2 = vpack.c.bf16 %v2612_v62, %v2612_v62  ;;  %v4858_v3 = vpack.c.bf16 %v2740_v63, %v2740_v63  ;;  %v2615_v4 = vmax.f32 %v5123_v0, 0.0  ;;  %v2743_v5 = vmax.f32 %v5251_v1, 0.0 }
 0x1ae   : > { %v1904_v6 = vpop.f32.mrf.mxu0  ;;  %v2416_v7 = vpop.f32.mrf.mxu1 }
 0x1af   : > { %3893 = vst.msk [vmem:[%s5672_s22 + $0x1a0] sm:$0xf] %vm3788_vm3, %v4730_v2  ;;  %4021 = vst.msk [vmem:[%s5672_s22 + $0x3a0] sm:$0xf] %vm3788_vm3, %v4858_v3  ;;  %v4733_v8 = vpack.c.bf16 %v2615_v4, %v2615_v4  ;;  %v4861_v9 = vpack.c.bf16 %v2743_v5, %v2743_v5  ;;  %v2613_v10 = vmax.f32 %v1904_v6, 0.0  ;;  %v2741_v11 = vmax.f32 %v2416_v7, 0.0 }
 0x1b0   : > { %v5126_v12 = vpop.f32.mrf.mxu0  ;;  %v5254_v13 = vpop.f32.mrf.mxu1 }
 0x1b1   : > { %3896 = vst.msk [vmem:[%s5672_s22 + $0x1ac] sm:$0xf] %vm3788_vm3, %v4733_v8  ;;  %4024 = vst.msk [vmem:[%s5672_s22 + $0x3ac] sm:$0xf] %vm3788_vm3, %v4861_v9  ;;  %v4731_v14 = vpack.c.bf16 %v2613_v10, %v2613_v10  ;;  %v4859_v15 = vpack.c.bf16 %v2741_v11, %v2741_v11  ;;  %v2618_v16 = vmax.f32 %v5126_v12, 0.0  ;;  %v2746_v17 = vmax.f32 %v5254_v13, 0.0 }
 0x1b2   : > { %v1917_v18 = vpop.f32.mrf.mxu0  ;;  %v2429_v19 = vpop.f32.mrf.mxu1 }
 0x1b3   : > { %3894 = vst.msk [vmem:[%s5672_s22 + $0x1a4] sm:$0xf] %vm3788_vm3, %v4731_v14  ;;  %4022 = vst.msk [vmem:[%s5672_s22 + $0x3a4] sm:$0xf] %vm3788_vm3, %v4859_v15  ;;  %v4736_v20 = vpack.c.bf16 %v2618_v16, %v2618_v16  ;;  %v4864_v21 = vpack.c.bf16 %v2746_v17, %v2746_v17  ;;  %v2616_v22 = vmax.f32 %v1917_v18, 0.0  ;;  %v2744_v23 = vmax.f32 %v2429_v19, 0.0 }
 0x1b4   : > { %v5127_v24 = vpop.f32.mrf.mxu0  ;;  %v5255_v25 = vpop.f32.mrf.mxu1 }
 0x1b5   : > { %3899 = vst.msk [vmem:[%s5672_s22 + $0x1b8] sm:$0xf] %vm3788_vm3, %v4736_v20  ;;  %4027 = vst.msk [vmem:[%s5672_s22 + $0x3b8] sm:$0xf] %vm3788_vm3, %v4864_v21  ;;  %v4734_v26 = vpack.c.bf16 %v2616_v22, %v2616_v22  ;;  %v4862_v27 = vpack.c.bf16 %v2744_v23, %v2744_v23  ;;  %v2619_v28 = vmax.f32 %v5127_v24, 0.0  ;;  %v2747_v29 = vmax.f32 %v5255_v25, 0.0 }
 0x1b6   : > { %v1920_v30 = vpop.f32.mrf.mxu0  ;;  %v2432_v31 = vpop.f32.mrf.mxu1 }
 0x1b7   : > { %3897 = vst.msk [vmem:[%s5672_s22 + $0x1b0] sm:$0xf] %vm3788_vm3, %v4734_v26  ;;  %4025 = vst.msk [vmem:[%s5672_s22 + $0x3b0] sm:$0xf] %vm3788_vm3, %v4862_v27  ;;  %v4737_v32 = vpack.c.bf16 %v2619_v28, %v2619_v28  ;;  %v4865_v33 = vpack.c.bf16 %v2747_v29, %v2747_v29  ;;  %v2617_v34 = vmax.f32 %v1920_v30, 0.0  ;;  %v2745_v35 = vmax.f32 %v2432_v31, 0.0 }
 0x1b8   : > { %v5130_v36 = vpop.f32.mrf.mxu0  ;;  %v5258_v37 = vpop.f32.mrf.mxu1 }
 0x1b9   : > { %3900 = vst.msk [vmem:[%s5672_s22 + $0x1bc] sm:$0xf] %vm3788_vm3, %v4737_v32  ;;  %4028 = vst.msk [vmem:[%s5672_s22 + $0x3bc] sm:$0xf] %vm3788_vm3, %v4865_v33  ;;  %v4735_v38 = vpack.c.bf16 %v2617_v34, %v2617_v34  ;;  %v4863_v39 = vpack.c.bf16 %v2745_v35, %v2745_v35  ;;  %v2622_v40 = vmax.f32 %v5130_v36, 0.0  ;;  %v2750_v41 = vmax.f32 %v5258_v37, 0.0 }
 0x1ba   : > { %v1933_v42 = vpop.f32.mrf.mxu0  ;;  %v2445_v43 = vpop.f32.mrf.mxu1 }
 0x1bb   : > { %3898 = vst.msk [vmem:[%s5672_s22 + $0x1b4] sm:$0xf] %vm3788_vm3, %v4735_v38  ;;  %4026 = vst.msk [vmem:[%s5672_s22 + $0x3b4] sm:$0xf] %vm3788_vm3, %v4863_v39  ;;  %v4740_v44 = vpack.c.bf16 %v2622_v40, %v2622_v40  ;;  %v4868_v45 = vpack.c.bf16 %v2750_v41, %v2750_v41  ;;  %v2620_v46 = vmax.f32 %v1933_v42, 0.0  ;;  %v2748_v47 = vmax.f32 %v2445_v43, 0.0 }
 0x1bc   : > { %v5131_v48 = vpop.f32.mrf.mxu0  ;;  %v5259_v49 = vpop.f32.mrf.mxu1 }
 0x1bd   : > { %3903 = vst.msk [vmem:[%s5672_s22 + $0x1c8] sm:$0xf] %vm3788_vm3, %v4740_v44  ;;  %4031 = vst.msk [vmem:[%s5672_s22 + $0x3c8] sm:$0xf] %vm3788_vm3, %v4868_v45  ;;  %v4738_v50 = vpack.c.bf16 %v2620_v46, %v2620_v46  ;;  %v4866_v51 = vpack.c.bf16 %v2748_v47, %v2748_v47  ;;  %v2623_v52 = vmax.f32 %v5131_v48, 0.0  ;;  %v2751_v53 = vmax.f32 %v5259_v49, 0.0 }
 0x1be   : > { %v1936_v54 = vpop.f32.mrf.mxu0  ;;  %v2448_v55 = vpop.f32.mrf.mxu1 }
 0x1bf   : > { %3901 = vst.msk [vmem:[%s5672_s22 + $0x1c0] sm:$0xf] %vm3788_vm3, %v4738_v50  ;;  %4029 = vst.msk [vmem:[%s5672_s22 + $0x3c0] sm:$0xf] %vm3788_vm3, %v4866_v51  ;;  %v4741_v56 = vpack.c.bf16 %v2623_v52, %v2623_v52  ;;  %v4869_v57 = vpack.c.bf16 %v2751_v53, %v2751_v53  ;;  %v2621_v58 = vmax.f32 %v1936_v54, 0.0  ;;  %v2749_v59 = vmax.f32 %v2448_v55, 0.0 }
 0x1c0   : > { %v5134_v60 = vpop.f32.mrf.mxu0  ;;  %v5262_v61 = vpop.f32.mrf.mxu1 }
 0x1c1   : > { %3904 = vst.msk [vmem:[%s5672_s22 + $0x1cc] sm:$0xf] %vm3788_vm3, %v4741_v56  ;;  %4032 = vst.msk [vmem:[%s5672_s22 + $0x3cc] sm:$0xf] %vm3788_vm3, %v4869_v57  ;;  %v4739_v62 = vpack.c.bf16 %v2621_v58, %v2621_v58  ;;  %v4867_v63 = vpack.c.bf16 %v2749_v59, %v2749_v59  ;;  %v2626_v0 = vmax.f32 %v5134_v60, 0.0  ;;  %v2754_v1 = vmax.f32 %v5262_v61, 0.0 }
 0x1c2   : > { %v1949_v2 = vpop.f32.mrf.mxu0  ;;  %v2461_v3 = vpop.f32.mrf.mxu1 }
 0x1c3   : > { %3902 = vst.msk [vmem:[%s5672_s22 + $0x1c4] sm:$0xf] %vm3788_vm3, %v4739_v62  ;;  %4030 = vst.msk [vmem:[%s5672_s22 + $0x3c4] sm:$0xf] %vm3788_vm3, %v4867_v63  ;;  %v4744_v4 = vpack.c.bf16 %v2626_v0, %v2626_v0  ;;  %v4872_v5 = vpack.c.bf16 %v2754_v1, %v2754_v1  ;;  %v2624_v6 = vmax.f32 %v1949_v2, 0.0  ;;  %v2752_v7 = vmax.f32 %v2461_v3, 0.0 }
 0x1c4   : > { %v5135_v8 = vpop.f32.mrf.mxu0  ;;  %v5263_v9 = vpop.f32.mrf.mxu1 }
 0x1c5   : > { %3907 = vst.msk [vmem:[%s5672_s22 + $0x1d8] sm:$0xf] %vm3788_vm3, %v4744_v4  ;;  %4035 = vst.msk [vmem:[%s5672_s22 + $0x3d8] sm:$0xf] %vm3788_vm3, %v4872_v5  ;;  %v4742_v10 = vpack.c.bf16 %v2624_v6, %v2624_v6  ;;  %v4870_v11 = vpack.c.bf16 %v2752_v7, %v2752_v7  ;;  %v2627_v12 = vmax.f32 %v5135_v8, 0.0  ;;  %v2755_v13 = vmax.f32 %v5263_v9, 0.0 }
 0x1c6   : > { %v1952_v14 = vpop.f32.mrf.mxu0  ;;  %v2464_v15 = vpop.f32.mrf.mxu1 }
 0x1c7   : > { %3905 = vst.msk [vmem:[%s5672_s22 + $0x1d0] sm:$0xf] %vm3788_vm3, %v4742_v10  ;;  %4033 = vst.msk [vmem:[%s5672_s22 + $0x3d0] sm:$0xf] %vm3788_vm3, %v4870_v11  ;;  %v4745_v16 = vpack.c.bf16 %v2627_v12, %v2627_v12  ;;  %v4873_v17 = vpack.c.bf16 %v2755_v13, %v2755_v13  ;;  %v2625_v18 = vmax.f32 %v1952_v14, 0.0  ;;  %v2753_v19 = vmax.f32 %v2464_v15, 0.0 }
 0x1c8   : > { %v5138_v20 = vpop.f32.mrf.mxu0  ;;  %v5266_v21 = vpop.f32.mrf.mxu1 }
 0x1c9   : > { %3908 = vst.msk [vmem:[%s5672_s22 + $0x1dc] sm:$0xf] %vm3788_vm3, %v4745_v16  ;;  %4036 = vst.msk [vmem:[%s5672_s22 + $0x3dc] sm:$0xf] %vm3788_vm3, %v4873_v17  ;;  %v4743_v22 = vpack.c.bf16 %v2625_v18, %v2625_v18  ;;  %v4871_v23 = vpack.c.bf16 %v2753_v19, %v2753_v19  ;;  %v2630_v24 = vmax.f32 %v5138_v20, 0.0  ;;  %v2758_v25 = vmax.f32 %v5266_v21, 0.0 }
 0x1ca   : > { %v1965_v26 = vpop.f32.mrf.mxu0  ;;  %v2477_v27 = vpop.f32.mrf.mxu1 }
 0x1cb   : > { %3906 = vst.msk [vmem:[%s5672_s22 + $0x1d4] sm:$0xf] %vm3788_vm3, %v4743_v22  ;;  %4034 = vst.msk [vmem:[%s5672_s22 + $0x3d4] sm:$0xf] %vm3788_vm3, %v4871_v23  ;;  %v4748_v28 = vpack.c.bf16 %v2630_v24, %v2630_v24  ;;  %v4876_v29 = vpack.c.bf16 %v2758_v25, %v2758_v25  ;;  %v2628_v30 = vmax.f32 %v1965_v26, 0.0  ;;  %v2756_v31 = vmax.f32 %v2477_v27, 0.0 }
 0x1cc   : > { %v5139_v32 = vpop.f32.mrf.mxu0  ;;  %v5267_v33 = vpop.f32.mrf.mxu1 }
 0x1cd   : > { %3911 = vst.msk [vmem:[%s5672_s22 + $0x1e8] sm:$0xf] %vm3788_vm3, %v4748_v28  ;;  %4039 = vst.msk [vmem:[%s5672_s22 + $0x3e8] sm:$0xf] %vm3788_vm3, %v4876_v29  ;;  %v4746_v34 = vpack.c.bf16 %v2628_v30, %v2628_v30  ;;  %v4874_v35 = vpack.c.bf16 %v2756_v31, %v2756_v31  ;;  %v2631_v36 = vmax.f32 %v5139_v32, 0.0  ;;  %v2759_v37 = vmax.f32 %v5267_v33, 0.0 }
 0x1ce   : > { %v1968_v38 = vpop.f32.mrf.mxu0  ;;  %v2480_v39 = vpop.f32.mrf.mxu1 }
 0x1cf   : > { %3909 = vst.msk [vmem:[%s5672_s22 + $0x1e0] sm:$0xf] %vm3788_vm3, %v4746_v34  ;;  %4037 = vst.msk [vmem:[%s5672_s22 + $0x3e0] sm:$0xf] %vm3788_vm3, %v4874_v35  ;;  %v4749_v40 = vpack.c.bf16 %v2631_v36, %v2631_v36  ;;  %v4877_v41 = vpack.c.bf16 %v2759_v37, %v2759_v37  ;;  %v2629_v42 = vmax.f32 %v1968_v38, 0.0  ;;  %v2757_v43 = vmax.f32 %v2480_v39, 0.0 }
 0x1d0   : > { %v5142_v44 = vpop.f32.mrf.mxu0  ;;  %v5270_v45 = vpop.f32.mrf.mxu1 }
 0x1d1   : > { %3912 = vst.msk [vmem:[%s5672_s22 + $0x1ec] sm:$0xf] %vm3788_vm3, %v4749_v40  ;;  %4040 = vst.msk [vmem:[%s5672_s22 + $0x3ec] sm:$0xf] %vm3788_vm3, %v4877_v41  ;;  %v4747_v46 = vpack.c.bf16 %v2629_v42, %v2629_v42  ;;  %v4875_v47 = vpack.c.bf16 %v2757_v43, %v2757_v43  ;;  %v2634_v48 = vmax.f32 %v5142_v44, 0.0  ;;  %v2762_v49 = vmax.f32 %v5270_v45, 0.0 }
 0x1d2   : > { %v1981_v50 = vpop.f32.mrf.mxu0  ;;  %v2493_v51 = vpop.f32.mrf.mxu1 }
 0x1d3   : > { %3910 = vst.msk [vmem:[%s5672_s22 + $0x1e4] sm:$0xf] %vm3788_vm3, %v4747_v46  ;;  %4038 = vst.msk [vmem:[%s5672_s22 + $0x3e4] sm:$0xf] %vm3788_vm3, %v4875_v47  ;;  %v4752_v52 = vpack.c.bf16 %v2634_v48, %v2634_v48  ;;  %v4880_v53 = vpack.c.bf16 %v2762_v49, %v2762_v49  ;;  %v2632_v54 = vmax.f32 %v1981_v50, 0.0  ;;  %v2760_v55 = vmax.f32 %v2493_v51, 0.0 }
 0x1d4   : > { %v5143_v56 = vpop.f32.mrf.mxu0  ;;  %v5271_v57 = vpop.f32.mrf.mxu1 }
 0x1d5   : > { %3915 = vst.msk [vmem:[%s5672_s22 + $0x1f8] sm:$0xf] %vm3788_vm3, %v4752_v52  ;;  %4043 = vst.msk [vmem:[%s5672_s22 + $0x3f8] sm:$0xf] %vm3788_vm3, %v4880_v53  ;;  %v4750_v58 = vpack.c.bf16 %v2632_v54, %v2632_v54  ;;  %v4878_v59 = vpack.c.bf16 %v2760_v55, %v2760_v55  ;;  %v2635_v60 = vmax.f32 %v5143_v56, 0.0  ;;  %v2763_v61 = vmax.f32 %v5271_v57, 0.0 }
 0x1d6   : > { %v1984_v62 = vpop.f32.mrf.mxu0  ;;  %v2496_v63 = vpop.f32.mrf.mxu1 }
 0x1d7   : > { %3913 = vst.msk [vmem:[%s5672_s22 + $0x1f0] sm:$0xf] %vm3788_vm3, %v4750_v58  ;;  %4041 = vst.msk [vmem:[%s5672_s22 + $0x3f0] sm:$0xf] %vm3788_vm3, %v4878_v59  ;;  %v4753_v0 = vpack.c.bf16 %v2635_v60, %v2635_v60  ;;  %v4881_v1 = vpack.c.bf16 %v2763_v61, %v2763_v61  ;;  %v2633_v2 = vmax.f32 %v1984_v62, 0.0  ;;  %v2761_v3 = vmax.f32 %v2496_v63, 0.0 }
 0x1d9   : > { %3916 = vst.msk [vmem:[%s5672_s22 + $0x1fc] sm:$0xf] %vm3788_vm3, %v4753_v0  ;;  %4044 = vst.msk [vmem:[%s5672_s22 + $0x3fc] sm:$0xf] %vm3788_vm3, %v4881_v1  ;;  %v4751_v4 = vpack.c.bf16 %v2633_v2, %v2633_v2  ;;  %v4879_v5 = vpack.c.bf16 %v2761_v3, %v2761_v3 }
 0x1db   : > { %3914 = vst.msk [vmem:[%s5672_s22 + $0x1f4] sm:$0xf] %vm3788_vm3, %v4751_v4  ;;  %4042 = vst.msk [vmem:[%s5672_s22 + $0x3f4] sm:$0xf] %vm3788_vm3, %v4879_v5 }
 0x1dc PF: > { %s12_s9 = sadd.s32 1, %s5421_s9  }
 0x1dd   : > { %p9_p4 = scmp.ge.s32.totalorder %s12_s9, 18  }
 0x1df   :  { %11 = sbr.rel (!%p9_p4) target bundleno = 1 (0x1), region = 58 }

</bundles_post_ra>
